<compile_context>
chip_gen: v7x
topology: tpu7x:2x2x1
jax: 0.10.0
libtpu: 0.0.40
codegen_flags: <defaults>
</compile_context>

<pallas_src>
import functools

import jax
import jax.numpy as jnp
from jax.experimental import pallas as pl
from jax.experimental.pallas import tpu as pltpu

BN_EPS = 1e-5

# (name, out_channels, num_blocks, first_block_stride)
RESNET34_LAYERS = (
    ("layer1", 64, 3, 1),
    ("layer2", 128, 4, 2),
    ("layer3", 256, 6, 2),
    ("layer4", 512, 3, 2),
)


def _round_up(x, m):
    return ((x + m - 1) // m) * m


def _largest_tile(M, cap):
    """Largest multiple of 8 (<= cap) dividing round_up(M, 8); 8 always works."""
    m8 = _round_up(max(M, 1), 8)
    cap = min(cap, m8)
    best, t = 8, 8
    while t <= cap:
        if m8 % t == 0:
            best = t
        t += 8
    return best


def _pick_tn(cout):
    """Never pads Cout; keeps >=2 Cout blocks for Cout>=256 (v7x 2-TC work)."""
    if cout >= 512 and cout % 256 == 0:
        return 256
    if cout > 128 and cout % 128 == 0:
        return 128
    return cout


# ---------------------------------------------------------------------------
# Fused single-K-step matmul (+ folded-BN shift, + optional ReLU)
# ---------------------------------------------------------------------------
def _make_matmul_kernel(relu):
    def kernel(x_ref, w_ref, shift_ref, o_ref):
        acc = jnp.dot(x_ref[...], w_ref[...], preferred_element_type=jnp.float32)
        y = acc + shift_ref[...]
        if relu:
            y = jnp.maximum(y, 0.0)
        o_ref[...] = y.astype(o_ref.dtype)
    return kernel


def fused_matmul(x, w, shift, relu=False, out_dtype=jnp.bfloat16):
    """out = act(x @ w + shift).  x:[M,K] (cast bf16), w:[K,Cout] bf16, shift:[1,Cout] f32."""
    M, K = x.shape
    Kw, cout = w.shape
    assert K == Kw and K <= 8192          # ResNet-34 explicit-path K <= 2304
    tn = _pick_tn(cout)
    cap = 1024 if K <= 768 else (512 if K <= 2304 else 256)
    tm = _largest_tile(M, cap)
    Mp = _round_up(M, tm)
    xb = x.astype(jnp.bfloat16)
    if Mp != M:
        xb = jnp.pad(xb, ((0, Mp - M), (0, 0)))

    out = pl.pallas_call(
        _make_matmul_kernel(relu),
        out_shape=jax.ShapeDtypeStruct((Mp, cout), out_dtype),
        grid_spec=pltpu.PrefetchScalarGridSpec(
            num_scalar_prefetch=0,
            # Cout-block axis outermost: weight / shift blocks stay resident
            # across the whole M sweep (no per-M-tile re-DMA of weight tiles).
            grid=(cout // tn, Mp // tm),
            in_specs=[
                pl.BlockSpec((tm, K), lambda j, i: (i, 0)),
                pl.BlockSpec((K, tn), lambda j, i: (0, j)),
                pl.BlockSpec((1, tn), lambda j, i: (0, j)),
            ],
            out_specs=pl.BlockSpec((tm, tn), lambda j, i: (i, j)),
        ),
        compiler_params=pltpu.CompilerParams(
            dimension_semantics=("parallel", "parallel")),
    )(xb, w, shift)
    return out[:M] if Mp != M else out


# ---------------------------------------------------------------------------
# Implicit-im2col stride-1 3x3 conv (+ folded BN shift, + optional ReLU)
# ---------------------------------------------------------------------------
def _make_conv3x3_kernel(offs, tm, relu):
    def kernel(x0_ref, x1_ref, w_ref, shift_ref, o_ref):
        # Two consecutive row blocks of the flattened padded activation form a
        # band that covers every tap's shifted window (requires tm >= 2*Wp+2).
        band = jnp.concatenate([x0_ref[...], x1_ref[...]], axis=0)   # (2*tm, Cin)
        acc = None
        for t, ofs in enumerate(offs):                                # 9 taps, unrolled
            lhs = band[ofs:ofs + tm, :]
            d = jnp.dot(lhs, w_ref[t], preferred_element_type=jnp.float32)
            acc = d if acc is None else acc + d
        y = acc + shift_ref[...]
        if relu:
            y = jnp.maximum(y, 0.0)
        o_ref[...] = y.astype(o_ref.dtype)
    return kernel


def conv3x3_s1(x, pc, relu):
    """Stride-1 3x3 conv + folded BN, no HBM patch matrix.

    x: [N,H,W,Cin] (bf16/f32), pc: {'w': [9,Cin,Cout] bf16 (scale folded),
    'shift': [1,Cout] f32}.  Returns [N,H,W,Cout] bf16.
    """
    N, H, W, cin = x.shape
    cout = pc["w"].shape[-1]
    Hp, Wp = H + 2, W + 2
    M = N * Hp * Wp                      # output rows in padded-position layout
    tn = _pick_tn(cout)
    cap = 1024 if cin <= 128 else (512 if cin <= 256 else 256)
    tm = max(_largest_tile(M, cap), _round_up(2 * Wp + 2, 8))
    Mp = _round_up(M, tm)
    n_i, n_j = Mp // tm, cout // tn

    # Zero-pad spatially, flatten rows; Wp+1 leading zero rows make all 9 tap
    # offsets non-negative; trailing rows so row block (i+1) always exists.
    lead = Wp + 1
    xf = jnp.pad(x.astype(jnp.bfloat16),
                 ((0, 0), (1, 1), (1, 1), (0, 0))).reshape(M, cin)
    rows_ext = (n_i + 1) * tm
    xf_ext = jnp.pad(xf, ((lead, rows_ext - lead - M), (0, 0)))

    offs = tuple(di * Wp + dj for di in range(3) for dj in range(3))

    out = pl.pallas_call(
        _make_conv3x3_kernel(offs, tm, relu),
        out_shape=jax.ShapeDtypeStruct((Mp, cout), jnp.bfloat16),
        grid_spec=pltpu.PrefetchScalarGridSpec(
            num_scalar_prefetch=0,
            grid=(n_j, n_i),             # Cout blocks outermost (resident weights)
            in_specs=[
                pl.BlockSpec((tm, cin), lambda j, i: (i, 0)),
                pl.BlockSpec((tm, cin), lambda j, i: (i + 1, 0)),
                pl.BlockSpec((9, cin, tn), lambda j, i: (0, 0, j)),
                pl.BlockSpec((1, tn), lambda j, i: (0, j)),
            ],
            out_specs=pl.BlockSpec((tm, tn), lambda j, i: (i, j)),
        ),
        compiler_params=pltpu.CompilerParams(
            dimension_semantics=("parallel", "parallel")),
    )(xf_ext, xf_ext, pc["w"], pc["shift"])

    out = out[:M] if Mp != M else out
    # Keep only interior positions (borders of the padded output grid are garbage).
    return out.reshape(N, Hp, Wp, cout)[:, 1:-1, 1:-1, :]


# ---------------------------------------------------------------------------
# Explicit-im2col path: 7x7 stem, stride-2 3x3 convs, 1x1 downsamples
# ---------------------------------------------------------------------------
def _im2col(x, kh, kw, stride, padding):
    N, H, W, cin = x.shape
    Ho = (H + 2 * padding - kh) // stride + 1
    Wo = (W + 2 * padding - kw) // stride + 1
    xb = x.astype(jnp.bfloat16)
    if padding:
        xb = jnp.pad(xb, ((0, 0), (padding, padding), (padding, padding), (0, 0)))
    patches = [xb[:, i:i + stride * Ho:stride, j:j + stride * Wo:stride, :]
               for i in range(kh) for j in range(kw)]
    if len(patches) == 1:
        X = patches[0].reshape(N * Ho * Wo, cin)
    else:
        X = jnp.concatenate(patches, axis=-1).reshape(N * Ho * Wo, kh * kw * cin)
    return X, (N, Ho, Wo)


def conv_bn_explicit(x, pc, stride, relu):
    ktaps, cin, cout = pc["w"].shape
    kh = int(round(ktaps ** 0.5))
    padding = (kh - 1) // 2              # 7x7 -> 3, 3x3 -> 1, 1x1 -> 0
    X, (N, Ho, Wo) = _im2col(x, kh, kh, stride, padding)
    wm = pc["w"].reshape(ktaps * cin, cout)
    out = fused_matmul(X, wm, pc["shift"], relu=relu)
    return out.reshape(N, Ho, Wo, cout)


# ---------------------------------------------------------------------------
# MaxPool 3x3 / stride 2 / pad 1 — fused XLA pairwise max (per perf review):
# one pass over the padded tensor, no 9x stacked window copy in HBM.
# ---------------------------------------------------------------------------
def maxpool2d_3x3_s2_p1(x):
    N, H, W, C = x.shape
    Ho = (H + 2 - 3) // 2 + 1
    Wo = (W + 2 - 3) // 2 + 1
    neg = jnp.finfo(x.dtype).min
    xp = jnp.pad(x, ((0, 0), (1, 1), (1, 1), (0, 0)), constant_values=neg)
    out = None
    for i in range(3):
        for j in range(3):
            win = xp[:, i:i + 2 * Ho:2, j:j + 2 * Wo:2, :]
            out = win if out is None else jnp.maximum(out, win)
    return out


# ---------------------------------------------------------------------------
# Global average pool (AdaptiveAvgPool2d((1,1))), tiled over the batch
# ---------------------------------------------------------------------------
def _avgpool_kernel(x_ref, o_ref):
    o_ref[...] = jnp.mean(x_ref[...].astype(jnp.float32), axis=1)


def global_avg_pool(x):
    N, H, W, C = x.shape
    nb = min(N, 8)
    Np = _round_up(N, nb)
    xr = x.reshape(N, H * W, C)
    if Np != N:
        xr = jnp.pad(xr, ((0, Np - N), (0, 0), (0, 0)))
    out = pl.pallas_call(
        _avgpool_kernel,
        out_shape=jax.ShapeDtypeStruct((Np, C), jnp.float32),
        grid_spec=pltpu.PrefetchScalarGridSpec(
            num_scalar_prefetch=0,
            grid=(Np // nb,),
            in_specs=[pl.BlockSpec((nb, H * W, C), lambda i: (i, 0, 0))],
            out_specs=pl.BlockSpec((nb, C), lambda i: (i, 0)),
        ),
        compiler_params=pltpu.CompilerParams(dimension_semantics=("parallel",)),
    )(xr)
    return out[:N] if Np != N else out


# ---------------------------------------------------------------------------
# ResNet-34 structure
# ---------------------------------------------------------------------------
def basic_block(x, p, stride):
    if stride == 1:
        out = conv3x3_s1(x, p["conv1"], relu=True)
    else:
        out = conv_bn_explicit(x, p["conv1"], stride, relu=True)
    if "down" in p:
        residual = conv_bn_explicit(x, p["down"], stride, relu=False)
    else:
        residual = x
    out = conv3x3_s1(out, p["conv2"], relu=False)
    # Residual add + ReLU: fused by XLA with the interior slice of the conv output.
    y = jnp.maximum(out.astype(jnp.float32) + residual.astype(jnp.float32), 0.0)
    return y.astype(jnp.bfloat16)


def resnet34_forward(packed, x_nchw, num_classes=1000):
    x = jnp.transpose(x_nchw, (0, 2, 3, 1))          # NCHW (PyTorch) -> NHWC
    x = conv_bn_explicit(x, packed["stem"], stride=2, relu=True)
    x = maxpool2d_3x3_s2_p1(x)
    for name, _, nblocks, stride in RESNET34_LAYERS:
        for bi in range(nblocks):
            x = basic_block(x, packed[name][bi], stride if bi == 0 else 1)
    pooled = global_avg_pool(x)                       # [N, 512] f32
    logits = fused_matmul(pooled, packed["fc_w"], packed["fc_shift"],
                          relu=False, out_dtype=jnp.float32)
    return logits[:, :num_classes]                    # drop the 1000->1024 pad


# ---------------------------------------------------------------------------
# Deterministic parameter init (mirrors the PyTorch __init__)
# ---------------------------------------------------------------------------
def _init_conv(key, cout, cin, kh, kw):
    fan_out = cout * kh * kw                          # kaiming_normal_, fan_out, relu
    std = (2.0 / fan_out) ** 0.5
    return jax.random.normal(key, (cout, cin, kh, kw), jnp.float32) * std


def _init_bn(c):
    return (jnp.ones((c,), jnp.float32), jnp.zeros((c,), jnp.float32),
            jnp.zeros((c,), jnp.float32), jnp.ones((c,), jnp.float32))


def _make_block_params(keys, cin, cout, stride):
    p = {"conv1": _init_conv(next(keys), cout, cin, 3, 3), "bn1": _init_bn(cout),
         "conv2": _init_conv(next(keys), cout, cout, 3, 3), "bn2": _init_bn(cout)}
    if stride != 1 or cin != cout:
        p["down_conv"] = _init_conv(next(keys), cout, cin, 1, 1)
        p["down_bn"] = _init_bn(cout)
    return p


def make_resnet34_params(key, num_classes=1000):
    keys = iter(jax.random.split(key, 64))
    params = {"conv1": _init_conv(next(keys), 64, 3, 7, 7), "bn1": _init_bn(64)}
    cin = 64
    for name, cout, blocks, stride in RESNET34_LAYERS:
        # TODO(synk): the reference _make_layer declares layer2/3/4 first blocks with
        # in_channels == out_channels, which cannot consume the previous layer's
        # output; standard ResNet-34 wiring (incoming channel count) is used here.
        layer = [_make_block_params(keys, cin, cout, stride)]
        for _ in range(1, blocks):
            layer.append(_make_block_params(keys, cout, cout, 1))
        params[name] = layer
        cin = cout
    bound = 1.0 / (512.0 ** 0.5)                      # nn.Linear default init
    params["fc_w"] = jax.random.uniform(next(keys), (num_classes, 512),
                                        jnp.float32, -bound, bound)
    params["fc_b"] = jax.random.uniform(next(keys), (num_classes,),
                                        jnp.float32, -bound, bound)
    return params


# ---------------------------------------------------------------------------
# One-time packing: fold BN scale INTO the bf16 weights, keep only the shift
# ---------------------------------------------------------------------------
def _pack_conv(w_oihw, bn):
    gamma, beta, mean, var = bn
    scale = gamma / jnp.sqrt(var + BN_EPS)            # [cout]
    shift = (beta - mean * scale).astype(jnp.float32)
    cout, cin, kh, kw = w_oihw.shape
    w = jnp.transpose(w_oihw, (2, 3, 1, 0)) * scale   # HWIO, BN scale folded
    w = w.reshape(kh * kw, cin, cout).astype(jnp.bfloat16)
    return {"w": w, "shift": shift.reshape(1, cout)}


def pack_resnet34_params(params):
    packed = {"stem": _pack_conv(params["conv1"], params["bn1"])}
    for name, _, _, _ in RESNET34_LAYERS:
        blocks = []
        for p in params[name]:
            b = {"conv1": _pack_conv(p["conv1"], p["bn1"]),
                 "conv2": _pack_conv(p["conv2"], p["bn2"])}
            if "down_conv" in p:
                b["down"] = _pack_conv(p["down_conv"], p["down_bn"])
            blocks.append(b)
        packed[name] = blocks
    nc = params["fc_w"].shape[0]
    ncp = _round_up(nc, 128)                          # lane-dense FC output (1000->1024)
    packed["fc_w"] = jnp.pad(params["fc_w"].T,
                             ((0, 0), (0, ncp - nc))).astype(jnp.bfloat16)
    packed["fc_shift"] = jnp.pad(params["fc_b"],
                                 (0, ncp - nc)).reshape(1, ncp).astype(jnp.float32)
    return packed


if __name__ == "__main__":
    key = jax.random.PRNGKey(0)
    pkey, xkey, ckey = jax.random.split(key, 3)

    # Tolerance self-check of the implicit-im2col conv against an f32 XLA conv
    # (review correctness item: bf16 MXU path will not bit-match f32).
    cx = jax.random.normal(jax.random.fold_in(ckey, 0), (2, 8, 8, 64), jnp.float32)
    cw = jax.random.normal(jax.random.fold_in(ckey, 1),
                           (64, 64, 3, 3), jnp.float32) * (2.0 / (64 * 9)) ** 0.5
    pc = _pack_conv(cw, _init_bn(64))
    got = jax.jit(lambda a: conv3x3_s1(a, pc, relu=False))(cx).astype(jnp.float32)
    ref = jax.lax.conv_general_dilated(
        cx, jnp.transpose(cw, (2, 3, 1, 0)), window_strides=(1, 1),
        padding=((1, 1), (1, 1)), dimension_numbers=("NHWC", "HWIO", "NHWC"),
        precision=jax.lax.Precision.HIGHEST)
    max_err = float(jnp.max(jnp.abs(got - ref)))
    assert max_err < 0.2, max_err

    raw_params = make_resnet34_params(pkey, num_classes=1000)
    packed = pack_resnet34_params(raw_params)         # one-time weight repack
    # Small input: 32x32 images so the /32 spatial reduction bottoms out at 1x1.
    x = jax.random.normal(xkey, (2, 3, 32, 32), jnp.float32)

    fwd = jax.jit(functools.partial(resnet34_forward, num_classes=1000))
    logits = jax.block_until_ready(fwd(packed, x))
    assert logits.shape == (2, 1000), logits.shape
    assert bool(jnp.all(jnp.isfinite(logits)))
    print("KERNEL_OK")
</pallas_src>

<mosaic_0001>
module attributes {stable_mosaic.version = 11 : i64} {
  func.func @kernel(%arg0: i32, %arg1: i32, %arg2: memref<200x64xbf16, #tpu.memory_space<vmem>>, %arg3: memref<200x64xbf16, #tpu.memory_space<vmem>>, %arg4: memref<9x64x64xbf16, #tpu.memory_space<vmem>>, %arg5: memref<1x64xf32, #tpu.memory_space<vmem>>, %arg6: memref<200x64xbf16, #tpu.memory_space<vmem>>) attributes {dimension_semantics = [#tpu.dimension_semantics<parallel>, #tpu.dimension_semantics<parallel>], iteration_bounds = array<i64: 1, 1>, scalar_prefetch = 0 : i64, scratch_operands = 0 : i64, tpu.core_type = #tpu.core_type<tc>, window_params = [{transform_indices = @transform_0, window_bounds = array<i64: 200, 64>}, {transform_indices = @transform_1, window_bounds = array<i64: 200, 64>}, {transform_indices = @transform_2, window_bounds = array<i64: 9, 64, 64>}, {transform_indices = @transform_3, window_bounds = array<i64: 1, 64>}, {transform_indices = @transform_4, window_bounds = array<i64: 200, 64>}]} {
    %c0 = arith.constant 0 : index
    %c0_0 = arith.constant 0 : index
    %0 = vector.load %arg2[%c0, %c0_0] : memref<200x64xbf16, #tpu.memory_space<vmem>>, vector<200x64xbf16>
    %c0_1 = arith.constant 0 : index
    %c0_2 = arith.constant 0 : index
    %1 = vector.load %arg3[%c0_1, %c0_2] : memref<200x64xbf16, #tpu.memory_space<vmem>>, vector<200x64xbf16>
    %2 = tpu.concatenate %0, %1 in 0 : vector<200x64xbf16>, vector<200x64xbf16> -> vector<400x64xbf16>
    %3 = vector.extract_strided_slice %2 {offsets = [0, 0], sizes = [200, 64], strides = [1, 1]} : vector<400x64xbf16> to vector<200x64xbf16>
    %c0_3 = arith.constant 0 : index
    %c0_4 = arith.constant 0 : index
    %c0_5 = arith.constant 0 : index
    %4 = vector.load %arg4[%c0_3, %c0_4, %c0_5] : memref<9x64x64xbf16, #tpu.memory_space<vmem>>, vector<1x64x64xbf16>
    %5 = vector.shape_cast %4 : vector<1x64x64xbf16> to vector<64x64xbf16>
    %cst = arith.constant dense<0.000000e+00> : vector<200x64xf32>
    %6 = tpu.matmul %3, %5, %cst {dimension_numbers = #tpu.dot_dimension_numbers<[1], [0], [0], [1], [0, 0, 1, 1], [], []>} : vector<200x64xbf16>, vector<64x64xbf16>, vector<200x64xf32> -> vector<200x64xf32>
    %7 = vector.extract_strided_slice %2 {offsets = [1, 0], sizes = [200, 64], strides = [1, 1]} : vector<400x64xbf16> to vector<200x64xbf16>
    %c1 = arith.constant 1 : index
    %c0_6 = arith.constant 0 : index
    %c0_7 = arith.constant 0 : index
    %8 = vector.load %arg4[%c1, %c0_6, %c0_7] : memref<9x64x64xbf16, #tpu.memory_space<vmem>>, vector<1x64x64xbf16>
    %9 = vector.shape_cast %8 : vector<1x64x64xbf16> to vector<64x64xbf16>
    %cst_8 = arith.constant dense<0.000000e+00> : vector<200x64xf32>
    %10 = tpu.matmul %7, %9, %cst_8 {dimension_numbers = #tpu.dot_dimension_numbers<[1], [0], [0], [1], [0, 0, 1, 1], [], []>} : vector<200x64xbf16>, vector<64x64xbf16>, vector<200x64xf32> -> vector<200x64xf32>
    %11 = arith.addf %6, %10 : vector<200x64xf32>
    %12 = vector.extract_strided_slice %2 {offsets = [2, 0], sizes = [200, 64], strides = [1, 1]} : vector<400x64xbf16> to vector<200x64xbf16>
    %c2 = arith.constant 2 : index
    %c0_9 = arith.constant 0 : index
    %c0_10 = arith.constant 0 : index
    %13 = vector.load %arg4[%c2, %c0_9, %c0_10] : memref<9x64x64xbf16, #tpu.memory_space<vmem>>, vector<1x64x64xbf16>
    %14 = vector.shape_cast %13 : vector<1x64x64xbf16> to vector<64x64xbf16>
    %cst_11 = arith.constant dense<0.000000e+00> : vector<200x64xf32>
    %15 = tpu.matmul %12, %14, %cst_11 {dimension_numbers = #tpu.dot_dimension_numbers<[1], [0], [0], [1], [0, 0, 1, 1], [], []>} : vector<200x64xbf16>, vector<64x64xbf16>, vector<200x64xf32> -> vector<200x64xf32>
    %16 = arith.addf %11, %15 : vector<200x64xf32>
    %17 = vector.extract_strided_slice %2 {offsets = [10, 0], sizes = [200, 64], strides = [1, 1]} : vector<400x64xbf16> to vector<200x64xbf16>
    %c3 = arith.constant 3 : index
    %c0_12 = arith.constant 0 : index
    %c0_13 = arith.constant 0 : index
    %18 = vector.load %arg4[%c3, %c0_12, %c0_13] : memref<9x64x64xbf16, #tpu.memory_space<vmem>>, vector<1x64x64xbf16>
    %19 = vector.shape_cast %18 : vector<1x64x64xbf16> to vector<64x64xbf16>
    %cst_14 = arith.constant dense<0.000000e+00> : vector<200x64xf32>
    %20 = tpu.matmul %17, %19, %cst_14 {dimension_numbers = #tpu.dot_dimension_numbers<[1], [0], [0], [1], [0, 0, 1, 1], [], []>} : vector<200x64xbf16>, vector<64x64xbf16>, vector<200x64xf32> -> vector<200x64xf32>
    %21 = arith.addf %16, %20 : vector<200x64xf32>
    %22 = vector.extract_strided_slice %2 {offsets = [11, 0], sizes = [200, 64], strides = [1, 1]} : vector<400x64xbf16> to vector<200x64xbf16>
    %c4 = arith.constant 4 : index
    %c0_15 = arith.constant 0 : index
    %c0_16 = arith.constant 0 : index
    %23 = vector.load %arg4[%c4, %c0_15, %c0_16] : memref<9x64x64xbf16, #tpu.memory_space<vmem>>, vector<1x64x64xbf16>
    %24 = vector.shape_cast %23 : vector<1x64x64xbf16> to vector<64x64xbf16>
    %cst_17 = arith.constant dense<0.000000e+00> : vector<200x64xf32>
    %25 = tpu.matmul %22, %24, %cst_17 {dimension_numbers = #tpu.dot_dimension_numbers<[1], [0], [0], [1], [0, 0, 1, 1], [], []>} : vector<200x64xbf16>, vector<64x64xbf16>, vector<200x64xf32> -> vector<200x64xf32>
    %26 = arith.addf %21, %25 : vector<200x64xf32>
    %27 = vector.extract_strided_slice %2 {offsets = [12, 0], sizes = [200, 64], strides = [1, 1]} : vector<400x64xbf16> to vector<200x64xbf16>
    %c5 = arith.constant 5 : index
    %c0_18 = arith.constant 0 : index
    %c0_19 = arith.constant 0 : index
    %28 = vector.load %arg4[%c5, %c0_18, %c0_19] : memref<9x64x64xbf16, #tpu.memory_space<vmem>>, vector<1x64x64xbf16>
    %29 = vector.shape_cast %28 : vector<1x64x64xbf16> to vector<64x64xbf16>
    %cst_20 = arith.constant dense<0.000000e+00> : vector<200x64xf32>
    %30 = tpu.matmul %27, %29, %cst_20 {dimension_numbers = #tpu.dot_dimension_numbers<[1], [0], [0], [1], [0, 0, 1, 1], [], []>} : vector<200x64xbf16>, vector<64x64xbf16>, vector<200x64xf32> -> vector<200x64xf32>
    %31 = arith.addf %26, %30 : vector<200x64xf32>
    %32 = vector.extract_strided_slice %2 {offsets = [20, 0], sizes = [200, 64], strides = [1, 1]} : vector<400x64xbf16> to vector<200x64xbf16>
    %c6 = arith.constant 6 : index
    %c0_21 = arith.constant 0 : index
    %c0_22 = arith.constant 0 : index
    %33 = vector.load %arg4[%c6, %c0_21, %c0_22] : memref<9x64x64xbf16, #tpu.memory_space<vmem>>, vector<1x64x64xbf16>
    %34 = vector.shape_cast %33 : vector<1x64x64xbf16> to vector<64x64xbf16>
    %cst_23 = arith.constant dense<0.000000e+00> : vector<200x64xf32>
    %35 = tpu.matmul %32, %34, %cst_23 {dimension_numbers = #tpu.dot_dimension_numbers<[1], [0], [0], [1], [0, 0, 1, 1], [], []>} : vector<200x64xbf16>, vector<64x64xbf16>, vector<200x64xf32> -> vector<200x64xf32>
    %36 = arith.addf %31, %35 : vector<200x64xf32>
    %37 = vector.extract_strided_slice %2 {offsets = [21, 0], sizes = [200, 64], strides = [1, 1]} : vector<400x64xbf16> to vector<200x64xbf16>
    %c7 = arith.constant 7 : index
    %c0_24 = arith.constant 0 : index
    %c0_25 = arith.constant 0 : index
    %38 = vector.load %arg4[%c7, %c0_24, %c0_25] : memref<9x64x64xbf16, #tpu.memory_space<vmem>>, vector<1x64x64xbf16>
    %39 = vector.shape_cast %38 : vector<1x64x64xbf16> to vector<64x64xbf16>
    %cst_26 = arith.constant dense<0.000000e+00> : vector<200x64xf32>
    %40 = tpu.matmul %37, %39, %cst_26 {dimension_numbers = #tpu.dot_dimension_numbers<[1], [0], [0], [1], [0, 0, 1, 1], [], []>} : vector<200x64xbf16>, vector<64x64xbf16>, vector<200x64xf32> -> vector<200x64xf32>
    %41 = arith.addf %36, %40 : vector<200x64xf32>
    %42 = vector.extract_strided_slice %2 {offsets = [22, 0], sizes = [200, 64], strides = [1, 1]} : vector<400x64xbf16> to vector<200x64xbf16>
    %c8 = arith.constant 8 : index
    %c0_27 = arith.constant 0 : index
    %c0_28 = arith.constant 0 : index
    %43 = vector.load %arg4[%c8, %c0_27, %c0_28] : memref<9x64x64xbf16, #tpu.memory_space<vmem>>, vector<1x64x64xbf16>
    %44 = vector.shape_cast %43 : vector<1x64x64xbf16> to vector<64x64xbf16>
    %cst_29 = arith.constant dense<0.000000e+00> : vector<200x64xf32>
    %45 = tpu.matmul %42, %44, %cst_29 {dimension_numbers = #tpu.dot_dimension_numbers<[1], [0], [0], [1], [0, 0, 1, 1], [], []>} : vector<200x64xbf16>, vector<64x64xbf16>, vector<200x64xf32> -> vector<200x64xf32>
    %46 = arith.addf %41, %45 : vector<200x64xf32>
    %c0_30 = arith.constant 0 : index
    %c0_31 = arith.constant 0 : index
    %47 = vector.load %arg5[%c0_30, %c0_31] : memref<1x64xf32, #tpu.memory_space<vmem>>, vector<1x64xf32>
    %48 = vector.broadcast %47 : vector<1x64xf32> to vector<200x64xf32>
    %49 = arith.addf %46, %48 : vector<200x64xf32>
    %50 = arith.truncf %49 : vector<200x64xf32> to vector<200x64xbf16>
    %c0_32 = arith.constant 0 : index
    %c0_33 = arith.constant 0 : index
    %51 = vector.load %arg6[%c0_32, %c0_33] : memref<200x64xbf16, #tpu.memory_space<vmem>>, vector<200x64xbf16>
    tpu.vector_store %arg6[%c0_32, %c0_33], %50 {strides = array<i32>} : memref<200x64xbf16, #tpu.memory_space<vmem>>, vector<200x64xbf16>,
    return
  }
  func.func @transform_0(%arg0: i32, %arg1: i32) -> (i32, i32) {
    %c0_i32 = arith.constant 0 : i32
    %c0_i32_0 = arith.constant 0 : i32
    return %arg1, %c0_i32 : i32, i32
  }
  func.func @transform_1(%arg0: i32, %arg1: i32) -> (i32, i32) {
    %c1_i32 = arith.constant 1 : i32
    %0 = arith.addi %arg1, %c1_i32 : i32
    %c0_i32 = arith.constant 0 : i32
    %c0_i32_0 = arith.constant 0 : i32
    return %0, %c0_i32 : i32, i32
  }
  func.func @transform_2(%arg0: i32, %arg1: i32) -> (i32, i32, i32) {
    %c0_i32 = arith.constant 0 : i32
    %c0_i32_0 = arith.constant 0 : i32
    %c0_i32_1 = arith.constant 0 : i32
    return %c0_i32, %c0_i32_0, %arg0 : i32, i32, i32
  }
  func.func @transform_3(%arg0: i32, %arg1: i32) -> (i32, i32) {
    %c0_i32 = arith.constant 0 : i32
    %c0_i32_0 = arith.constant 0 : i32
    return %c0_i32, %arg0 : i32, i32
  }
  func.func @transform_4(%arg0: i32, %arg1: i32) -> (i32, i32) {
    %c0_i32 = arith.constant 0 : i32
    return %arg1, %arg0 : i32, i32
  }
}

</mosaic_0001>

<bundles_post_ra>
// kernel: _lambda_.1
= control target key start
LH: loop header
LB: loop body
LE: loop exit
PB: predicated region body
PF: predicated region fallthrough
CT: control target
= control target key end

     0   :  { %v5192_v0 = vmov 0.0   ;;  %vm3751_vm0 = vmmov 0   ;;  %vm160_vm1 = vsmask.f32 7424  ;;  %vm287_vm2 = vcmask 523264   ;;  %s5185_s2 = inlined_call_operand.vmem [shape: bf16[9,64,64], index: 2, kind: input, shape index: {}]   ;;  %s5186_s0 = inlined_call_operand.vmem [shape: bf16[400,64], index: 0, kind: input, shape index: {}, may-alias: {0,1}]   ;;  %s5187_s1 = inlined_call_operand.vmem [shape: bf16[400,64], index: 1, kind: input, shape index: {}, may-alias: {0,1}]   ;;  %s5188_s3 = inlined_call_operand.vmem [shape: f32[1,64], index: 3, kind: input, shape index: {}]   ;;  %s5189_s4 = inlined_call_operand.vmem [shape: bf16[200,64], index: 4, kind: output, shape index: {}]  }
   0x1   :  { %3136 = vmatprep.subr.bf16.mxu0 %v5192_v0  ;;  %3676 = vmatprep.subr.bf16.mxu1 %v5192_v0  ;;  %v3686_v1 = vld [vmem:[%s5185_s2 + $0x20] sm:$0xff]   ;;  %v3687_v2 = vld [vmem:[%s5185_s2 + $0x28] sm:$0xff]   ;;  %v3688_v3 = vld [vmem:[%s5185_s2 + $0x30] sm:$0xff]   ;;  %vm139_vm3 = vcmask 1043456   ;;  %vm659_vm4 = vcmask 1046528   ;;  %vm918_vm5 = vcmask 1042432  }
   0x2   :  { %3144 = vmatprep.mubr.msk.bf16.mxu0 %vm3751_vm0, %v5192_v0  ;;  %3172 = vmatprep.mubr.msk.bf16.mxu1 %vm3751_vm0, %v5192_v0  ;;  %v3797_v4 = vld [vmem:[%s5186_s0] sm:$0xff]   ;;  %v3802_v5 = vld [vmem:[%s5186_s0 + $0x8] sm:$0xff]   ;;  %v3814_v9 = vld [vmem:[%s5186_s0 + $0x38] sm:$0xff]   ;;  %vm1179_vm6 = vsmask.f32 2304  ;;  %vm1473_vm7 = vcmask 1041408  }
   0x3   :  { %3137 = vmatpush3.bf16.msra.mxu0 %v3686_v1  ;;  %3680 = vmatpush3.bf16.msra.mxu1 %v3686_v1  ;;  %v162_v6 = vshrl.u32 %v3797_v4, 16  ;;  %v164_v7 = vshll.u32 %v3797_v4, 16  ;;  %v3809_v8 = vshll.u32 %v3802_v5, 16  ;;  %v3819_v10 = vld [vmem:[%s5186_s0 + $0x40] sm:$0xff]   ;;  %v3689_v11 = vld [vmem:[%s5185_s2 + $0x38] sm:$0xff]   ;;  %v3828_v14 = vshll.u32 %v3814_v9, 16 }
   0x4   :  { %3138 = vmatprep.subr.bf16.mxu0 %v5192_v0  ;;  %3677 = vmatprep.subr.bf16.mxu1 %v5192_v0  ;;  %v3831_v15 = vshrl.u32 %v3814_v9, 16  ;;  %v3834_v16 = vshll.u32 %v3819_v10, 16  ;;  %v3839_v17 = vld [vmem:[%s5186_s0 + $0x10] sm:$0xff]   ;;  %v3848_v21 = vshrl.u32 %v3802_v5, 16  ;;  %v3853_v22 = vld [vmem:[%s5186_s0 + $0x48] sm:$0xff]   ;;  %v3694_v23 = vld [vmem:[%s5185_s2 + $0x40] sm:$0xff]  }
   0x5   :  { %v166_v12 = vrot.slane %v164_v7, 1  ;;  %v171_v13 = vrot.slane %v3809_v8, 1  ;;  %5208 = vst [vmem:[#allocation2_spill] sm:$0xff] %v3828_v14  ;;  %v219_v19 = vrot.slane %v3828_v14, 1  ;;  %v3859_v24 = vshll.u32 %v3839_v17, 16  ;;  %v3695_v29 = vld [vmem:[%s5185_s2] sm:$0xff]  }
   0x6   :  { %5209 = vst [vmem:[#allocation3_spill] sm:$0xff] %v3831_v15  ;;  %5210 = vst [vmem:[#allocation4_spill] sm:$0xff] %v3834_v16  ;;  %v227_v20 = vrot.slane %v3834_v16, 1  ;;  %v3866_v27 = vshrl.u32 %v3819_v10, 16  ;;  %v3869_v28 = vshll.u32 %v3853_v22, 16  ;;  %v3698_v31 = vld [vmem:[%s5185_s2 + $0x48] sm:$0xff]  }
   0x7   :  { %3139 = vmatpush3.bf16.msra.mxu0 %v3687_v2  ;;  %3681 = vmatpush3.bf16.msra.mxu1 %v3687_v2  ;;  %v167_v18 = vor.u32 %v166_v12, %v162_v6  ;;  %v223_v26 = vor.u32 %v3831_v15, %v219_v19  ;;  %v179_v32 = vrot.slane %v3859_v24, 1  ;;  %v3886_v33 = vld [vmem:[%s5186_s0 + $0x18] sm:$0xff]   ;;  %v175_v34 = vor.u32 %v3848_v21, %v171_v13  ;;  %v3896_v37 = vld [vmem:[%s5186_s0 + $0x50] sm:$0xff]   ;;  %v3701_v38 = vld [vmem:[%s5185_s2 + $0x8] sm:$0xff]  }
   0x8   :  { %3140 = vmatprep.subr.bf16.mxu0 %v5192_v0  ;;  %3678 = vmatprep.subr.bf16.mxu1 %v5192_v0  ;;  %5211 = vst [vmem:[#allocation5_spill] sm:$0xff] %v3866_v27  ;;  %5212 = vst [vmem:[#allocation6_spill] sm:$0xff] %v3869_v28  ;;  %v231_v35 = vor.u32 %v3866_v27, %v227_v20  ;;  %v235_v36 = vrot.slane %v3869_v28, 1  ;;  %v3905_v39 = vshrl.u32 %v3839_v17, 16  ;;  %v3909_v40 = vshll.u32 %v3886_v33, 16  ;;  %v3704_v45 = vld [vmem:[%s5185_s2 + $0x50] sm:$0xff]  }
   0x9   :  { %v172_v25 = vsel %vm160_vm1, %v167_v18, %v171_v13  ;;  %v228_v30 = vsel %vm160_vm1, %v223_v26, %v227_v20  ;;  %v3912_v41 = vshrl.u32 %v3853_v22, 16  ;;  %v180_v42 = vsel %vm160_vm1, %v175_v34, %v179_v32  ;;  %v3705_v46 = vld [vmem:[%s5185_s2 + $0x10] sm:$0xff]   ;;  %v3932_v47 = vld [vmem:[%s5186_s0 + $0x20] sm:$0xff]   ;;  %v3945_v52 = vld [vmem:[%s5186_s0 + $0x58] sm:$0xff]  }
   0xa   :  { %v236_v43 = vsel %vm160_vm1, %v231_v35, %v235_v36  ;;  %v3917_v44 = vshll.u32 %v3896_v37, 16  ;;  %v183_v48 = vor.u32 %v3905_v39, %v179_v32  ;;  %v187_v49 = vrot.slane %v3909_v40, 1  ;;  %v3710_v53 = vld [vmem:[%s5185_s2 + $0x18] sm:$0xff]   ;;  %v3707_v61 = vld [vmem:[%s5186_s0 + $0x60] ss:$0 sps:$4 sm:$0xff]  }
   0xb   :  { %3141 = vmatpush3.bf16.msra.mxu0 %v3688_v3  ;;  %3682 = vmatpush3.bf16.msra.mxu1 %v3688_v3  ;;  %5213 = vst [vmem:[#allocation7_spill] sm:$0xff] %v3912_v41  ;;  %v239_v50 = vor.u32 %v3912_v41, %v235_v36  ;;  %v3711_v54 = vld [vmem:[%s5185_s2 + $0x58] sm:$0xff]   ;;  %v3956_v55 = vshrl.u32 %v3886_v33, 16  ;;  %v3959_v56 = vshll.u32 %v3932_v47, 16  ;;  %v3964_v59 = vshrl.u32 %v3896_v37, 16 }
   0xc   :  { %3142 = vmatprep.subr.bf16.mxu0 %v5192_v0  ;;  %3679 = vmatprep.subr.bf16.mxu1 %v5192_v0  ;;  %5214 = vst [vmem:[#allocation8_spill] sm:$0xff] %v3917_v44  ;;  %v243_v51 = vrot.slane %v3917_v44, 1  ;;  %v188_v57 = vsel %vm160_vm1, %v183_v48, %v187_v49  ;;  %v3967_v60 = vshll.u32 %v3945_v52, 16  ;;  %v3708_v62 = vld [vmem:[%s5187_s1 + $0x64] ss:$0 sps:$4 sm:$0xff]   ;;  %v3996_v13 = vrot.slane %v162_v6, 5 }
   0xd   :  { %5215 = vst [vmem:[#allocation9_spill] sm:$0xff] %v3964_v59  ;;  %v191_v63 = vor.u32 %v3956_v55, %v187_v49  ;;  %v195_v1 = vrot.slane %v3959_v56, 1  ;;  %v3991_v12 = vsel %vm139_vm3, %v3707_v61, %v3708_v62  ;;  %v4000_v20 = vshrl.u32 %v3932_v47, 16 }
   0xe   :  { %v244_v58 = vsel %vm160_vm1, %v239_v50, %v243_v51  ;;  %5216 = vst [vmem:[#allocation10_spill] sm:$0xff] %v3967_v60  ;;  %v247_v2 = vor.u32 %v3964_v59, %v243_v51  ;;  %v251_v3 = vrot.slane %v3967_v60, 1  ;;  %v4007_v26 = vshrl.u32 %v3945_v52, 16 }
   0xf   :  { %3143 = vmatpush3.bf16.msra.mxu0 %v3689_v11  ;;  %3683 = vmatpush3.bf16.msra.mxu1 %v3689_v11  ;;  %v3989_v11 = vld [vmem:[%s5186_s0 + $0x28] sm:$0xff]   ;;  %v196_v18 = vsel %vm160_vm1, %v191_v63, %v195_v1  ;;  %v4014_v6 = vrot.slane %v164_v7, 6  ;;  %v661_v61 = vrot.slane %v3802_v5, 1  ;;  %v3713_v63 = vld [vmem:[%s5185_s2 + $0x80] sm:$0xff]   ;;  %vm1734_vm8 = vcmask 1045504  }
  0x10   :  { %3256 = vmatprep.subr.bf16.mxu0 %v5192_v0  ;;  %3196 = vmatprep.subr.bf16.mxu1 %v5192_v0  ;;  %5217 = vst [vmem:[#allocation11_spill] sm:$0xff] %v4007_v26  ;;  %v255_v32 = vor.u32 %v4007_v26, %v251_v3  ;;  %v4032_v35 = vshrl.u32 %v3989_v11, 16  ;;  %vm1993_vm9 = vsmask.f32 5376  ;;  %vm2278_vm10 = vcmask 1044480  }
  0x11   :  { %vm2661_vm11 = vcmask 519168  }
  0x12   :  { %3145 = vmatmul.mubr.msk.bf16.vlgmr.msra.gmra.mrb[0].mxu0 %vm287_vm2, %v172_v25  ;;  %3173 = vmatmul.mubr.msk.bf16.vlgmr.msra.gmra.mrb[0].mxu1 %vm287_vm2, %v228_v30  ;;  %v4004_v25 = vshll.u32 %v3989_v11, 16  ;;  %v4019_v30 = vld [vmem:[%s5186_s0 + $0x30] sm:$0xff]  }
  0x13   :  { %3257 = vmatpush3.bf16.msra.mxu0 %v3694_v23  ;;  %3148 = vmatprep.mubr.msk.bf16.mxu0 %vm3751_vm0, %v5192_v0  ;;  %v252_v23 = vsel %vm160_vm1, %v247_v2, %v251_v3  ;;  %v4035_v36 = vshll.u32 %v4019_v30, 16  ;;  %v4055_v51 = vshrl.u32 %v4019_v30, 16  ;;  %v663_v2 = vrot.slane %v3839_v17, 1  ;;  %v3715_v3 = vld [vmem:[%s5185_s2 + $0x88] sm:$0xff]  }
  0x14   :  { %3176 = vmatprep.mubr.msk.bf16.mxu1 %vm3751_vm0, %v5192_v0  ;;  %3197 = vmatpush3.bf16.msra.mxu1 %v3695_v29  ;;  %v4010_v29 = vshll.u32 %v3991_v12, 16  ;;  %v203_v7 = vrot.slane %v4004_v25, 1 }
  0x15   :  { %3258 = vmatprep.subr.bf16.mxu0 %v5192_v0  ;;  %3198 = vmatprep.subr.bf16.mxu1 %v5192_v0  ;;  %5219 = vst [vmem:[#allocation13_spill] sm:$0xff] %v4035_v36  ;;  %5221 = vst [vmem:[#allocation15_spill] sm:$0xff] %v4055_v51 }
  0x16   :  { %5218 = vst [vmem:[#allocation12_spill] sm:$0xff] %v4010_v29  ;;  %v258_v34 = vrot.slane %v4010_v29, 1  ;;  %v207_v48 = vor.u32 %v4032_v35, %v203_v7 }
  0x17   :  { %3259 = vmatpush3.bf16.msra.mxu0 %v3698_v31  ;;  %v199_v31 = vor.u32 %v4000_v20, %v195_v1  ;;  %v3716_v1 = vld [vmem:[%s5185_s2 + $0x70] sm:$0xff]  }
  0x18   :  { %3199 = vmatpush3.bf16.msra.mxu1 %v3701_v38  ;;  %3260 = vmatprep.subr.bf16.mxu0 %v5192_v0 }
  0x19   :  { %3200 = vmatprep.subr.bf16.mxu1 %v5192_v0  ;;  %v204_v38 = vsel %vm160_vm1, %v199_v31, %v203_v7  ;;  %v3717_v31 = vld [vmem:[%s5185_s2 + $0x90] sm:$0xff]   ;;  %v665_v7 = vrot.slane %v3886_v33, 1 }
  0x1a   :  { %3149 = vmatmul.mubr.msk.bf16.gmra.mrb[4].mxu0 %vm287_vm2, %v180_v42  ;;  %3177 = vmatmul.mubr.msk.bf16.gmra.mrb[4].mxu1 %vm287_vm2, %v236_v43  ;;  %v259_v42 = vsel %vm160_vm1, %v255_v32, %v258_v34  ;;  %v1182_v43 = vor.u32 %v4014_v6, %v3996_v13  ;;  %v3719_v32 = vld [vmem:[%s5185_s2 + $0x98] sm:$0xff]   ;;  %v924_v13 = vrot.slane %v3886_v33, 5 }
  0x1b   :  { %3152 = vmatprep.mubr.msk.bf16.mxu0 %vm3751_vm0, %v5192_v0  ;;  %3180 = vmatprep.mubr.msk.bf16.mxu1 %vm3751_vm0, %v5192_v0 }
  0x1c   :  { %3261 = vmatpush3.bf16.msra.mxu0 %v3704_v45  ;;  %3201 = vmatpush3.bf16.msra.mxu1 %v3705_v46  ;;  %v211_v45 = vrot.slane %v4035_v36, 1  ;;  %v4045_v46 = vshrl.u32 %v3991_v12, 16 }
  0x1d   :  { %3202 = vmatprep.subr.bf16.mxu1 %v5192_v0  ;;  %3262 = vmatprep.subr.bf16.mxu0 %v5192_v0 }
  0x1e   :  { %5220 = vst [vmem:[#allocation14_spill] sm:$0xff] %v4045_v46  ;;  %v262_v49 = vor.u32 %v4045_v46, %v258_v34  ;;  %v212_v50 = vsel %vm160_vm1, %v207_v48, %v211_v45  ;;  %v666_v34 = vsel %vm659_vm4, %v663_v2, %v665_v7 }
  0x20   :  { %3203 = vmatpush3.bf16.msra.mxu1 %v3710_v53  ;;  %3263 = vmatpush3.bf16.msra.mxu0 %v3711_v54  ;;  %v215_v53 = vor.u32 %v4055_v51, %v211_v45  ;;  %v669_v45 = vrot.slane %v3989_v11, 1 }
  0x21   :  { %3316 = vmatprep.subr.bf16.mxu1 %v5192_v0  ;;  %3376 = vmatprep.subr.bf16.mxu0 %v5192_v0 }
  0x22   :  { %3153 = vmatmul.mubr.msk.bf16.gmra.mrb[8].mxu0 %vm287_vm2, %v188_v57  ;;  %3181 = vmatmul.mubr.msk.bf16.gmra.mrb[8].mxu1 %vm287_vm2, %v244_v58  ;;  %v220_v54 = vsel %vm160_vm1, %v215_v53, %v219_v19  ;;  %v3712_v57 = vld [vmem:[%s5185_s2 + $0x60] sm:$0xff]   ;;  %v660_v58 = vrot.slane %v3797_v4, 1  ;;  %v3714_v19 = vld [vmem:[%s5185_s2 + $0x68] sm:$0xff]   ;;  %v673_v53 = vrot.slane %v3814_v9, 1 }
  0x23   :  { %3156 = vmatprep.mubr.msk.bf16.mxu0 %vm3751_vm0, %v5192_v0  ;;  %3184 = vmatprep.mubr.msk.bf16.mxu1 %vm3751_vm0, %v5192_v0 }
  0x24   :  { %v662_v62 = vsel %vm659_vm4, %v660_v58, %v661_v61 }
  0x2a   :  { %3157 = vmatmul.mubr.msk.bf16.gmra.mrb[12].mxu0 %vm287_vm2, %v196_v18  ;;  %3185 = vmatmul.mubr.msk.bf16.gmra.mrb[12].mxu1 %vm287_vm2, %v252_v23  ;;  %v3718_v18 = vld [vmem:[%s5185_s2 + $0x78] sm:$0xff]   ;;  %v664_v23 = vsel %vm659_vm4, %v661_v61, %v663_v2  ;;  %v677_v61 = vrot.slane %v3853_v22, 1 }
  0x2b   :  { %3160 = vmatprep.mubr.msk.bf16.mxu0 %vm3751_vm0, %v5192_v0  ;;  %3188 = vmatprep.mubr.msk.bf16.mxu1 %vm3751_vm0, %v5192_v0 }
  0x32   :  { %3161 = vmatmul.mubr.msk.bf16.gmra.mrb[16].mxu0 %vm287_vm2, %v204_v38  ;;  %3189 = vmatmul.mubr.msk.bf16.gmra.mrb[16].mxu1 %vm287_vm2, %v259_v42  ;;  %v667_v38 = vrot.slane %v3932_v47, 1 }
  0x33   :  { %3164 = vmatprep.mubr.msk.bf16.mxu0 %vm3751_vm0, %v5192_v0  ;;  %3192 = vmatprep.mubr.msk.bf16.mxu1 %vm3751_vm0, %v5192_v0 }
  0x34   :  { %v668_v42 = vsel %vm659_vm4, %v665_v7, %v667_v38  ;;  %v670_v48 = vsel %vm659_vm4, %v667_v38, %v669_v45  ;;  %v3720_v38 = vld [vmem:[%s5185_s2 + $0xa0] sm:$0xff]  }
  0x3a   :  { %3165 = vmatmul.mubr.msk.bf16.gmra.mrb[20].mxu0 %vm287_vm2, %v212_v50  ;;  %3193 = vmatmul.mubr.msk.bf16.gmra.mrb[20].mxu1 %vm287_vm2, %v262_v49  ;;  %v671_v49 = vrot.slane %v4019_v30, 1 }
  0x3b   :  { %3168 = vmatprep.mubr.msk.bf16.mxu0 %vm3751_vm0, %v5192_v0  ;;  %3204 = vmatprep.mubr.msk.bf16.mxu1 %vm3751_vm0, %v5192_v0 }
  0x3c   :  { %v672_v50 = vsel %vm659_vm4, %v669_v45, %v671_v49 }
  0x42   :  { %3169 = vmatmul.mubr.msk.bf16.gmra.mrb[24].mxu0 %vm287_vm2, %v220_v54  ;;  %3205 = vmatmul.mubr.msk.bf16.vlgmr.msra.gmra.mrb[24].mxu1 %vm287_vm2, %v3797_v4  ;;  %v674_v54 = vsel %vm659_vm4, %v671_v49, %v673_v53  ;;  %v1187_v49 = vrot.slane %v3905_v39, 5 }
  0x43   :  { %3208 = vmatprep.mubr.msk.bf16.mxu1 %vm3751_vm0, %v5192_v0  ;;  %3264 = vmatprep.mubr.msk.bf16.mxu0 %vm3751_vm0, %v5192_v0 }
  0x44   :  { %3317 = vmatpush3.bf16.msra.mxu1 %v3712_v57  ;;  %v675_v57 = vrot.slane %v3819_v10, 1 }
  0x45   :  { %3318 = vmatprep.subr.bf16.mxu1 %v5192_v0 }
  0x46   :  { %v676_v58 = vsel %vm659_vm4, %v673_v53, %v675_v57  ;;  %v3724_v53 = vld [vmem:[%s5185_s2 + $0xb0] sm:$0xff]  }
  0x48   :  { %3319 = vmatpush3.bf16.msra.mxu1 %v3714_v19  ;;  %v678_v19 = vsel %vm659_vm4, %v675_v57, %v677_v61 }
  0x49   :  { %3320 = vmatprep.subr.bf16.mxu1 %v5192_v0 }
  0x4a   :  { %3209 = vmatmul.mubr.msk.bf16.gmra.mrb[28].mxu1 %vm287_vm2, %v3802_v5  ;;  %3265 = vmatmul.mubr.msk.bf16.vlgmr.msra.gmra.mrb[28].mxu0 %vm287_vm2, %v662_v62  ;;  %v679_v62 = vrot.slane %v3896_v37, 1 }
  0x4b   :  { %3377 = vmatpush3.bf16.msra.mxu0 %v3713_v63  ;;  %3212 = vmatprep.mubr.msk.bf16.mxu1 %vm3751_vm0, %v5192_v0 }
  0x4c   :  { %3268 = vmatprep.mubr.msk.bf16.mxu0 %vm3751_vm0, %v5192_v0  ;;  %3378 = vmatprep.subr.bf16.mxu0 %v5192_v0  ;;  %v680_v63 = vsel %vm659_vm4, %v677_v61, %v679_v62  ;;  %v1192_v61 = vrot.slane %v3909_v40, 6 }
  0x4d   :  { %3321 = vmatpush3.bf16.msra.mxu1 %v3716_v1  ;;  %v681_v1 = vrot.slane %v3945_v52, 1 }
  0x4e   :  { %3322 = vmatprep.subr.bf16.mxu1 %v5192_v0 }
  0x4f   :  { %3379 = vmatpush3.bf16.msra.mxu0 %v3715_v3  ;;  %v682_v2 = vsel %vm659_vm4, %v679_v62, %v681_v1  ;;  %v683_v3 = vrot.slane %v3991_v12, 1  ;;  %v926_v62 = vrot.slane %v3932_v47, 5 }
  0x50   :  { %3380 = vmatprep.subr.bf16.mxu0 %v5192_v0 }
  0x51   :  { %3323 = vmatpush3.bf16.msra.mxu1 %v3718_v18  ;;  %v684_v18 = vsel %vm659_vm4, %v681_v1, %v683_v3  ;;  %v3727_v1 = vld [vmem:[%s5185_s2 + $0xd8] sm:$0xff]  }
  0x52   :  { %3213 = vmatmul.mubr.msk.bf16.gmra.mrb[32].mxu1 %vm287_vm2, %v3839_v17  ;;  %3269 = vmatmul.mubr.msk.bf16.gmra.mrb[32].mxu0 %vm287_vm2, %v664_v23  ;;  %v919_v23 = vrot.slane %v3797_v4, 5  ;;  %v922_v4 = vrot.slane %v3839_v17, 5  ;;  %v3721_v17 = vld [vmem:[%s5185_s2 + $0xc0] sm:$0xff]  }
  0x53   :  { %3216 = vmatprep.mubr.msk.bf16.mxu1 %vm3751_vm0, %v5192_v0  ;;  %3272 = vmatprep.mubr.msk.bf16.mxu0 %vm3751_vm0, %v5192_v0 }
  0x54   :  { %3381 = vmatpush3.bf16.msra.mxu0 %v3717_v31  ;;  %3436 = vmatprep.subr.bf16.mxu1 %v5192_v0  ;;  %v920_v31 = vrot.slane %v3802_v5, 5  ;;  %v925_v57 = vsel %vm918_vm5, %v922_v4, %v924_v13 }
  0x55   :  { %3382 = vmatprep.subr.bf16.mxu0 %v5192_v0 }
  0x56   :  { %v921_v7 = vsel %vm918_vm5, %v919_v23, %v920_v31  ;;  %v923_v45 = vsel %vm918_vm5, %v920_v31, %v922_v4  ;;  %v1196_v23 = vrot.slane %v3959_v56, 6  ;;  %v928_v31 = vrot.slane %v3989_v11, 5 }
  0x57   :  { %v1200_v4 = vrot.slane %v4004_v25, 6 }
  0x58   :  { %3383 = vmatpush3.bf16.msra.mxu0 %v3719_v32  ;;  %v1183_v32 = vrot.slane %v3848_v21, 5 }
  0x59   :  { %3496 = vmatprep.subr.bf16.mxu0 %v5192_v0 }
  0x5a   :  { %3217 = vmatmul.mubr.msk.bf16.gmra.mrb[36].mxu1 %vm287_vm2, %v3886_v33  ;;  %3273 = vmatmul.mubr.msk.bf16.gmra.mrb[36].mxu0 %vm287_vm2, %v666_v34  ;;  %v1184_v34 = vrot.slane %v3809_v8, 6 }
  0x5b   :  { %3220 = vmatprep.mubr.msk.bf16.mxu1 %vm3751_vm0, %v5192_v0  ;;  %3276 = vmatprep.mubr.msk.bf16.mxu0 %vm3751_vm0, %v5192_v0 }
  0x5c   :  { %v1185_v5 = vor.u32 %v1184_v34, %v1183_v32  ;;  %v929_v32 = vsel %vm918_vm5, %v926_v62, %v928_v31 }
  0x62   :  { %3221 = vmatmul.mubr.msk.bf16.gmra.mrb[40].mxu1 %vm287_vm2, %v3932_v47  ;;  %3277 = vmatmul.mubr.msk.bf16.gmra.mrb[40].mxu0 %vm287_vm2, %v668_v42  ;;  %v3722_v42 = vld [vmem:[%s5185_s2 + $0xa8] sm:$0xff]  }
  0x63   :  { %3224 = vmatprep.mubr.msk.bf16.mxu1 %vm3751_vm0, %v5192_v0  ;;  %3280 = vmatprep.mubr.msk.bf16.mxu0 %vm3751_vm0, %v5192_v0 }
  0x6a   :  { %3225 = vmatmul.mubr.msk.bf16.gmra.mrb[44].mxu1 %vm287_vm2, %v3989_v11  ;;  %3281 = vmatmul.mubr.msk.bf16.gmra.mrb[44].mxu0 %vm287_vm2, %v670_v48  ;;  %v1186_v48 = vsel %vm1179_vm6, %v1182_v43, %v1185_v5  ;;  %v3723_v43 = vld [vmem:[%s5185_s2 + $0xc8] sm:$0xff]  }
  0x6b   :  { %3228 = vmatprep.mubr.msk.bf16.mxu1 %vm3751_vm0, %v5192_v0  ;;  %3284 = vmatprep.mubr.msk.bf16.mxu0 %vm3751_vm0, %v5192_v0 }
  0x72   :  { %3229 = vmatmul.mubr.msk.bf16.gmra.mrb[48].mxu1 %vm287_vm2, %v4019_v30  ;;  %3285 = vmatmul.mubr.msk.bf16.gmra.mrb[48].mxu0 %vm287_vm2, %v672_v50  ;;  %v1188_v50 = vrot.slane %v3859_v24, 6 }
  0x73   :  { %3232 = vmatprep.mubr.msk.bf16.mxu1 %vm3751_vm0, %v5192_v0  ;;  %3288 = vmatprep.mubr.msk.bf16.mxu0 %vm3751_vm0, %v5192_v0 }
  0x74   :  { %v1189_v6 = vor.u32 %v1188_v50, %v1187_v49  ;;  %v1204_v49 = vrot.slane %v4035_v36, 6  ;;  %v932_v50 = vrot.slane %v3814_v9, 5 }
  0x76   :  { %v1190_v33 = vsel %vm1179_vm6, %v1185_v5, %v1189_v6  ;;  %v930_v5 = vrot.slane %v4019_v30, 5 }
  0x7a   :  { %3233 = vmatmul.mubr.msk.bf16.gmra.mrb[52].mxu1 %vm287_vm2, %v3814_v9  ;;  %3289 = vmatmul.mubr.msk.bf16.gmra.mrb[52].mxu0 %vm287_vm2, %v674_v54  ;;  %v3726_v54 = vld [vmem:[%s5185_s2 + $0xb8] sm:$0xff]   ;;  %v934_v9 = vrot.slane %v3819_v10, 5 }
  0x7b   :  { %3236 = vmatprep.mubr.msk.bf16.mxu1 %vm3751_vm0, %v5192_v0  ;;  %3292 = vmatprep.mubr.msk.bf16.mxu0 %vm3751_vm0, %v5192_v0 }
  0x82   :  { %3237 = vmatmul.mubr.msk.bf16.gmra.mrb[56].mxu1 %vm287_vm2, %v3819_v10  ;;  %3293 = vmatmul.mubr.msk.bf16.gmra.mrb[56].mxu0 %vm287_vm2, %v676_v58  ;;  %v1191_v58 = vrot.slane %v3956_v55, 5  ;;  %v936_v10 = vrot.slane %v3853_v22, 5 }
  0x83   :  { %3240 = vmatprep.mubr.msk.bf16.mxu1 %vm3751_vm0, %v5192_v0  ;;  %3296 = vmatprep.mubr.msk.bf16.mxu0 %vm3751_vm0, %v5192_v0 }
  0x8a   :  { %3241 = vmatmul.mubr.msk.bf16.gmra.mrb[60].mxu1 %vm287_vm2, %v3853_v22  ;;  %3297 = vmatmul.mubr.msk.bf16.gmra.mrb[60].mxu0 %vm287_vm2, %v678_v19  ;;  %v3725_v19 = vld [vmem:[%s5185_s2 + $0xd0] sm:$0xff]  }
  0x8b   :  { %3244 = vmatprep.mubr.msk.bf16.mxu1 %vm3751_vm0, %v5192_v0  ;;  %3300 = vmatprep.mubr.msk.bf16.mxu0 %vm3751_vm0, %v5192_v0 }
  0x92   :  { %3245 = vmatmul.mubr.msk.bf16.gmra.mrb[64].mxu1 %vm287_vm2, %v3896_v37  ;;  %3301 = vmatmul.mubr.msk.bf16.gmra.mrb[64].mxu0 %vm287_vm2, %v680_v63  ;;  %v1193_v63 = vor.u32 %v1192_v61, %v1191_v58  ;;  %v1211_v61 = vrot.slane %v3866_v27, 5 }
  0x93   :  { %3248 = vmatprep.mubr.msk.bf16.mxu1 %vm3751_vm0, %v5192_v0  ;;  %3304 = vmatprep.mubr.msk.bf16.mxu0 %vm3751_vm0, %v5192_v0 }
  0x9a   :  { %3249 = vmatmul.mubr.msk.bf16.gmra.mrb[68].mxu1 %vm287_vm2, %v3945_v52  ;;  %3305 = vmatmul.mubr.msk.bf16.gmra.mrb[68].mxu0 %vm287_vm2, %v682_v2  ;;  %v927_v2 = vsel %vm918_vm5, %v924_v13, %v926_v62  ;;  %v933_v13 = vsel %vm918_vm5, %v930_v5, %v932_v50 }
  0x9b   :  { %3252 = vmatprep.mubr.msk.bf16.mxu1 %vm3751_vm0, %v5192_v0  ;;  %3308 = vmatprep.mubr.msk.bf16.mxu0 %vm3751_vm0, %v5192_v0 }
  0xa2   :  { %3253 = vmatmul.mubr.msk.bf16.gmra.mrb[72].mxu1 %vm287_vm2, %v3991_v12  ;;  %3309 = vmatmul.mubr.msk.bf16.gmra.mrb[72].mxu0 %vm287_vm2, %v684_v18  ;;  %v1195_v18 = vrot.slane %v4000_v20, 5 }
  0xa3   :  { %3312 = vmatprep.mubr.msk.bf16.mxu0 %vm3751_vm0, %v5192_v0  ;;  %3324 = vmatprep.mubr.msk.bf16.mxu1 %vm3751_vm0, %v5192_v0 }
  0xaa   :  { %3313 = vmatmul.mubr.msk.bf16.gmra.mrb[76].mxu0 %vm287_vm2, %v683_v3  ;;  %3325 = vmatmul.mubr.msk.bf16.vlgmr.msra.gmra.mrb[76].mxu1 %vm287_vm2, %v921_v7  ;;  %v1194_v3 = vsel %vm1179_vm6, %v1189_v6, %v1193_v63  ;;  %v1197_v7 = vor.u32 %v1196_v23, %v1195_v18  ;;  %v937_v23 = vsel %vm918_vm5, %v934_v9, %v936_v10 }
  0xab   :  { %3328 = vmatprep.mubr.msk.bf16.mxu1 %vm3751_vm0, %v5192_v0  ;;  %3384 = vmatprep.mubr.msk.bf16.mxu0 %vm3751_vm0, %v5192_v0 }
  0xac   :  { %3437 = vmatpush3.bf16.msra.mxu1 %v3720_v38  ;;  %v1198_v34 = vsel %vm1179_vm6, %v1193_v63, %v1197_v7  ;;  %v1199_v38 = vrot.slane %v4032_v35, 5 }
  0xad   :  { %3438 = vmatprep.subr.bf16.mxu1 %v5192_v0 }
  0xb0   :  { %3439 = vmatpush3.bf16.msra.mxu1 %v3722_v42  ;;  %v1201_v42 = vor.u32 %v1200_v4, %v1199_v38  ;;  %v938_v4 = vrot.slane %v3896_v37, 5 }
  0xb1   :  { %3440 = vmatprep.subr.bf16.mxu1 %v5192_v0 }
  0xb2   :  { %3329 = vmatmul.mubr.msk.bf16.gmra.mrb[80].mxu1 %vm287_vm2, %v923_v45  ;;  %3385 = vmatmul.mubr.msk.bf16.vlgmr.msra.gmra.mrb[80].mxu0 %vm287_vm2, %v1186_v48  ;;  %v931_v45 = vsel %vm918_vm5, %v928_v31, %v930_v5  ;;  %v1202_v48 = vsel %vm1179_vm6, %v1197_v7, %v1201_v42 }
  0xb3   :  { %3497 = vmatpush3.bf16.msra.mxu0 %v3721_v17  ;;  %3332 = vmatprep.mubr.msk.bf16.mxu1 %vm3751_vm0, %v5192_v0  ;;  %v1203_v17 = vrot.slane %v4055_v51, 5 }
  0xb4   :  { %3388 = vmatprep.mubr.msk.bf16.mxu0 %vm3751_vm0, %v5192_v0  ;;  %3498 = vmatprep.subr.bf16.mxu0 %v5192_v0 }
  0xb5   :  { %3441 = vmatpush3.bf16.msra.mxu1 %v3724_v53  ;;  %v1205_v53 = vor.u32 %v1204_v49, %v1203_v17 }
  0xb6   :  { %3442 = vmatprep.subr.bf16.mxu1 %v5192_v0 }
  0xb7   :  { %3499 = vmatpush3.bf16.msra.mxu0 %v3723_v43  ;;  %v1206_v6 = vsel %vm1179_vm6, %v1201_v42, %v1205_v53  ;;  %v1207_v43 = vrot.slane %v3831_v15, 5 }
  0xb8   :  { %3500 = vmatprep.subr.bf16.mxu0 %v5192_v0 }
  0xb9   :  { %3443 = vmatpush3.bf16.msra.mxu1 %v3726_v54  ;;  %v1208_v54 = vrot.slane %v3828_v14, 6 }
  0xba   :  { %3333 = vmatmul.mubr.msk.bf16.gmra.mrb[84].mxu1 %vm287_vm2, %v925_v57  ;;  %3389 = vmatmul.mubr.msk.bf16.gmra.mrb[84].mxu0 %vm287_vm2, %v1190_v33  ;;  %v935_v33 = vsel %vm918_vm5, %v932_v50, %v934_v9  ;;  %v939_v50 = vsel %vm918_vm5, %v936_v10, %v938_v4  ;;  %v940_v9 = vrot.slane %v3945_v52, 5 }
  0xbb   :  { %3336 = vmatprep.mubr.msk.bf16.mxu1 %vm3751_vm0, %v5192_v0  ;;  %3392 = vmatprep.mubr.msk.bf16.mxu0 %vm3751_vm0, %v5192_v0  ;;  %v1209_v57 = vor.u32 %v1208_v54, %v1207_v43  ;;  %v1220_v43 = vrot.slane %v3917_v44, 6 }
  0xbc   :  { %3501 = vmatpush3.bf16.msra.mxu0 %v3725_v19  ;;  %3556 = vmatprep.subr.bf16.mxu1 %v5192_v0  ;;  %v1212_v19 = vrot.slane %v3834_v16, 6 }
  0xbd   :  { %3502 = vmatprep.subr.bf16.mxu0 %v5192_v0  ;;  %v1210_v58 = vsel %vm1179_vm6, %v1205_v53, %v1209_v57 }
  0xbe   :  { %v1213_v62 = vor.u32 %v1212_v19, %v1211_v61 }
  0xc0   :  { %3503 = vmatpush3.bf16.msra.mxu0 %v3727_v1  ;;  %v1214_v31 = vsel %vm1179_vm6, %v1209_v57, %v1213_v62 }
  0xc1   :  { %3616 = vmatprep.subr.bf16.mxu0 %v5192_v0 }
  0xc2   :  { %3337 = vmatmul.mubr.msk.bf16.gmra.mrb[88].mxu1 %vm287_vm2, %v927_v2  ;;  %3393 = vmatmul.mubr.msk.bf16.gmra.mrb[88].mxu0 %vm287_vm2, %v1194_v3 }
  0xc3   :  { %3340 = vmatprep.mubr.msk.bf16.mxu1 %vm3751_vm0, %v5192_v0  ;;  %3396 = vmatprep.mubr.msk.bf16.mxu0 %vm3751_vm0, %v5192_v0 }
  0xca   :  { %3341 = vmatmul.mubr.msk.bf16.gmra.mrb[92].mxu1 %vm287_vm2, %v929_v32  ;;  %3397 = vmatmul.mubr.msk.bf16.gmra.mrb[92].mxu0 %vm287_vm2, %v1198_v34  ;;  %v1215_v32 = vrot.slane %v3912_v41, 5  ;;  %v1216_v34 = vrot.slane %v3869_v28, 6 }
  0xcb   :  { %3344 = vmatprep.mubr.msk.bf16.mxu1 %vm3751_vm0, %v5192_v0  ;;  %3400 = vmatprep.mubr.msk.bf16.mxu0 %vm3751_vm0, %v5192_v0 }
  0xcc   :  { %v1217_v5 = vor.u32 %v1216_v34, %v1215_v32  ;;  %v942_v34 = vrot.slane %v3991_v12, 5 }
  0xce   :  { %v1218_v53 = vsel %vm1179_vm6, %v1213_v62, %v1217_v5  ;;  %v941_v62 = vsel %vm918_vm5, %v938_v4, %v940_v9 }
  0xd2   :  { %3345 = vmatmul.mubr.msk.bf16.gmra.mrb[96].mxu1 %vm287_vm2, %v931_v45  ;;  %3401 = vmatmul.mubr.msk.bf16.gmra.mrb[96].mxu0 %vm287_vm2, %v1202_v48 }
  0xd3   :  { %3348 = vmatprep.mubr.msk.bf16.mxu1 %vm3751_vm0, %v5192_v0  ;;  %3404 = vmatprep.mubr.msk.bf16.mxu0 %vm3751_vm0, %v5192_v0 }
  0xda   :  { %3349 = vmatmul.mubr.msk.bf16.gmra.mrb[100].mxu1 %vm287_vm2, %v933_v13  ;;  %3405 = vmatmul.mubr.msk.bf16.gmra.mrb[100].mxu0 %vm287_vm2, %v1206_v6  ;;  %v1219_v6 = vrot.slane %v3964_v59, 5  ;;  %v3730_v59 = vld [vmem:[%s5185_s2 + $0x100] sm:$0xff]  }
  0xdb   :  { %3352 = vmatprep.mubr.msk.bf16.mxu1 %vm3751_vm0, %v5192_v0  ;;  %3408 = vmatprep.mubr.msk.bf16.mxu0 %vm3751_vm0, %v5192_v0 }
  0xdc   :  { %v1221_v57 = vor.u32 %v1220_v43, %v1219_v6  ;;  %v4409_v43 = vld [vmem:[%s5187_s1 + $0x68] sm:$0xff]  }
  0xe2   :  { %3353 = vmatmul.mubr.msk.bf16.gmra.mrb[104].mxu1 %vm287_vm2, %v935_v33  ;;  %3409 = vmatmul.mubr.msk.bf16.gmra.mrb[104].mxu0 %vm287_vm2, %v1210_v58 }
  0xe3   :  { %3356 = vmatprep.mubr.msk.bf16.mxu1 %vm3751_vm0, %v5192_v0  ;;  %3412 = vmatprep.mubr.msk.bf16.mxu0 %vm3751_vm0, %v5192_v0 }
  0xe5   :  { %v4339_v63 = vpop.f32.mrb[0].mxu0  ;;  %v4341_v1 = vpop.f32.mrb[0].mxu1 }
  0xe6   :  { %v3146_v2 = vpop.f32.mrb[1].mxu0  ;;  %v3174_v3 = vpop.f32.mrb[1].mxu1 }
  0xe7   :  { %v4343_v18 = vpop.f32.mrb[2].mxu0  ;;  %v4347_v7 = vpop.f32.mrb[2].mxu1  ;;  %v1222_v2 = vsel %vm1179_vm6, %v1217_v5, %v1221_v57 }
  0xe8   :  { %v3147_v22 = vpop.f32.mrb[3].mxu0  ;;  %v3175_v38 = vpop.f32.mrb[3].mxu1 }
  0xea   :  { %3357 = vmatmul.mubr.msk.bf16.gmra.mrb[108].mxu1 %vm287_vm2, %v937_v23  ;;  %3413 = vmatmul.mubr.msk.bf16.gmra.mrb[108].mxu0 %vm287_vm2, %v1214_v31  ;;  %v1223_v23 = vrot.slane %v4007_v26, 5  ;;  %v1224_v31 = vrot.slane %v3967_v60, 6 }
  0xeb   :  { %3360 = vmatprep.mubr.msk.bf16.mxu1 %vm3751_vm0, %v5192_v0  ;;  %3416 = vmatprep.mubr.msk.bf16.mxu0 %vm3751_vm0, %v5192_v0 }
  0xec   :  { %v1225_v22 = vor.u32 %v1224_v31, %v1223_v23 }
  0xed   :  { %v4358_v42 = vpop.f32.mrb[4].mxu0  ;;  %v4360_v45 = vpop.f32.mrb[4].mxu1 }
  0xee   :  { %v3150_v48 = vpop.f32.mrb[5].mxu0  ;;  %v3178_v17 = vpop.f32.mrb[5].mxu1 }
  0xef   :  { %v4362_v49 = vpop.f32.mrb[6].mxu0  ;;  %v4366_v13 = vpop.f32.mrb[6].mxu1 }
  0xf0   :  { %v3151_v37 = vpop.f32.mrb[7].mxu0  ;;  %v3179_v54 = vpop.f32.mrb[7].mxu1 }
  0xf1   :  { %v1227_v37 = vrot.slane %v4045_v46, 5  ;;  %v1228_v54 = vrot.slane %v4010_v29, 6  ;;  %v3729_v29 = vld [vmem:[%s5185_s2 + $0xe0] sm:$0xff]   ;;  %v5222_v46 = vmov 0.0  }
  0xf2   :  { %3361 = vmatmul.mubr.msk.bf16.gmra.mrb[112].mxu1 %vm287_vm2, %v939_v50  ;;  %3417 = vmatmul.mubr.msk.bf16.gmra.mrb[112].mxu0 %vm287_vm2, %v1218_v53  ;;  %v943_v50 = vsel %vm918_vm5, %v940_v9, %v942_v34  ;;  %v1226_v53 = vsel %vm1179_vm6, %v1221_v57, %v1225_v22  ;;  %v944_v9 = vrot.slane %v4409_v43, 5 }
  0xf3   :  { %3364 = vmatprep.mubr.msk.bf16.mxu1 %vm3751_vm0, %v5192_v0  ;;  %3420 = vmatprep.mubr.msk.bf16.mxu0 %vm3751_vm0, %v5192_v0  ;;  %v1229_v57 = vor.u32 %v1228_v54, %v1227_v37 }
  0xf5   :  { %v4377_v33 = vpop.f32.mrb[8].mxu0  ;;  %v4379_v58 = vpop.f32.mrb[8].mxu1 }
  0xf6   :  { %v3154_v61 = vpop.f32.mrb[9].mxu0  ;;  %v3182_v19 = vpop.f32.mrb[9].mxu1 }
  0xf7   :  { %v4381_v10 = vpop.f32.mrb[10].mxu0  ;;  %v4385_v3 = vpop.f32.mrb[10].mxu1 }
  0xf8   :  { %v3155_v52 = vpop.f32.mrb[11].mxu0  ;;  %v3183_v32 = vpop.f32.mrb[11].mxu1 }
  0xfa   :  { %3365 = vmatmul.mubr.msk.bf16.gmra.mrb[116].mxu1 %vm287_vm2, %v941_v62  ;;  %3421 = vmatmul.mubr.msk.bf16.gmra.mrb[116].mxu0 %vm287_vm2, %v1222_v2  ;;  %v5191_v62 = vshrl.u32 %v4409_v43, 16  ;;  %v5190_v2 = vshll.u32 %v4409_v43, 16 }
  0xfb   :  { %3368 = vmatprep.mubr.msk.bf16.mxu1 %vm3751_vm0, %v5192_v0  ;;  %3424 = vmatprep.mubr.msk.bf16.mxu0 %vm3751_vm0, %v5192_v0 }
  0xfc   :  { %v1234_v37 = vrot.slane %v5191_v62, 5  ;;  %v1237_v54 = vrot.slane %v5190_v2, 6 }
  0xfd   :  { %v4396_v38 = vpop.f32.mrb[12].mxu0  ;;  %v4398_v4 = vpop.f32.mrb[12].mxu1 }
  0xfe   :  { %v3158_v5 = vpop.f32.mrb[13].mxu0  ;;  %v3186_v48 = vpop.f32.mrb[13].mxu1 }
  0xff   :  { %v4400_v17 = vpop.f32.mrb[14].mxu0  ;;  %v4404_v6 = vpop.f32.mrb[14].mxu1  ;;  %v945_v48 = vsel %vm918_vm5, %v942_v34, %v944_v9  ;;  %v1238_v34 = vor.u32 %v1237_v54, %v1234_v37 }
 0x100   :  { %v3159_v61 = vpop.f32.mrb[15].mxu0  ;;  %v3187_v19 = vpop.f32.mrb[15].mxu1 }
 0x101   :  { %v1239_v54 = vsel %vm1179_vm6, %v1229_v57, %v1238_v34  ;;  %v3731_v34 = vld [vmem:[%s5185_s2 + $0xe8] sm:$0xff]  }
 0x102   :  { %3369 = vmatmul.mubr.msk.bf16.gmra.mrb[120].mxu1 %vm287_vm2, %v943_v50  ;;  %3425 = vmatmul.mubr.msk.bf16.gmra.mrb[120].mxu0 %vm287_vm2, %v1226_v53  ;;  %v1230_v50 = vsel %vm1179_vm6, %v1225_v22, %v1229_v57  ;;  %v3737_v22 = vld [vmem:[%s5186_s0] sm:$0xff]   ;;  %v4471_v57 = vld [vmem:[%s5186_s0 + $0x10] sm:$0xff]  }
 0x103   :  { %3372 = vmatprep.mubr.msk.bf16.mxu1 %vm3751_vm0, %v5192_v0  ;;  %3428 = vmatprep.mubr.msk.bf16.mxu0 %vm3751_vm0, %v5192_v0  ;;  %v1474_v9 = vrot.slane %v3737_v22, 6 }
 0x105   :  { %v4422_v23 = vpop.f32.mrb[16].mxu0  ;;  %v4424_v31 = vpop.f32.mrb[16].mxu1 }
 0x106   :  { %v3162_v52 = vpop.f32.mrb[17].mxu0  ;;  %v3190_v32 = vpop.f32.mrb[17].mxu1 }
 0x107   :  { %v4426_v5 = vpop.f32.mrb[18].mxu0  ;;  %v4430_v53 = vpop.f32.mrb[18].mxu1  ;;  %v4448_v52 = vld [vmem:[%s5186_s0 + $0x8] sm:$0xff]  }
 0x108   :  { %v3163_v61 = vpop.f32.mrb[19].mxu0  ;;  %v3191_v19 = vpop.f32.mrb[19].mxu1  ;;  %v1475_v32 = vrot.slane %v4448_v52, 6 }
 0x10a   :  { %3373 = vmatmul.mubr.msk.bf16.gmra.mrb[124].mxu1 %vm287_vm2, %v945_v48  ;;  %3429 = vmatmul.mubr.msk.bf16.gmra.mrb[124].mxu0 %vm287_vm2, %v1230_v50  ;;  %v1476_v22 = vsel %vm1473_vm7, %v1474_v9, %v1475_v32 }
 0x10b   :  { %3432 = vmatprep.mubr.msk.bf16.mxu0 %vm3751_vm0, %v5192_v0  ;;  %3444 = vmatprep.mubr.msk.bf16.mxu1 %vm3751_vm0, %v5192_v0 }
 0x10d   :  { %v4451_v48 = vpop.f32.mrb[20].mxu0  ;;  %v4453_v50 = vpop.f32.mrb[20].mxu1 }
 0x10e   :  { %v3166_v61 = vpop.f32.mrb[21].mxu0  ;;  %v3194_v19 = vpop.f32.mrb[21].mxu1 }
 0x10f   :  { %v4455_v37 = vpop.f32.mrb[22].mxu0  ;;  %v460_v2 = vpop.f32.mrb[22].mxu1 }
 0x110   :  { %v3167_v62 = vpop.f32.mrb[23].mxu0  ;;  %v3195_v0 = vpop.f32.mrb[23].mxu1  ;;  %v1736_v2 = vrot.slane %v4471_v57, 2 }
 0x111   :  { %v1477_v0 = vrot.slane %v4471_v57, 6  ;;  %v1735_v62 = vrot.slane %v4448_v52, 2 }
 0x112   :  { %3433 = vmatmul.mubr.msk.bf16.gmra.mrb[128].mxu0 %vm287_vm2, %v1239_v54  ;;  %3445 = vmatmul.mubr.msk.bf16.vlgmr.msra.gmra.mrb[128].mxu1 %vm287_vm2, %v1476_v22 }
 0x113   :  { %3448 = vmatprep.mubr.msk.bf16.mxu1 %vm3751_vm0, %v5222_v46  ;;  %3504 = vmatprep.mubr.msk.bf16.mxu0 %vm3751_vm0, %v5222_v46  ;;  %v1478_v44 = vsel %vm1473_vm7, %v1475_v32, %v1477_v0  ;;  %v3735_v32 = vld [vmem:[%s5185_s2 + $0xf8] sm:$0xff]  }
 0x114   :  { %3557 = vmatpush3.bf16.msra.mxu1 %v3729_v29  ;;  %v1737_v29 = vsel %vm1734_vm8, %v1735_v62, %v1736_v2 }
 0x115   :  { %v4479_v9 = vpop.f32.mrb[24].mxu0  ;;  %v547_v61 = vpop.f32.mrb[24].mxu1  ;;  %3558 = vmatprep.subr.bf16.mxu1 %v5222_v46 }
 0x116   :  { %v548_v19 = vadd.f32 %v547_v61, %v4339_v63  ;;  %v3170_v54 = vpop.f32.mrb[25].mxu0  ;;  %v3206_v22 = vpop.f32.mrb[25].mxu1  ;;  %v3733_v63 = vld [vmem:[%s5185_s2 + $0xf0] sm:$0xff]  }
 0x117   :  { %v4483_v60 = vpop.f32.mrb[26].mxu0  ;;  %v550_v26 = vpop.f32.mrb[26].mxu1 }
 0x118   :  { %v551_v28 = vadd.f32 %v550_v26, %v4343_v18  ;;  %v3171_v41 = vpop.f32.mrb[27].mxu0  ;;  %v3207_v16 = vpop.f32.mrb[27].mxu1  ;;  %3559 = vmatpush3.bf16.msra.mxu1 %v3731_v34  ;;  %v3732_v18 = vld [vmem:[%s5185_s2 + $0x108] sm:$0xff]  }
 0x119   :  { %3560 = vmatprep.subr.bf16.mxu1 %v5222_v46  ;;  %v4502_v41 = vld [vmem:[%s5186_s0 + $0x18] sm:$0xff]  }
 0x11a   :  { %3449 = vmatmul.mubr.msk.bf16.gmra.mrb[132].mxu1 %vm287_vm2, %v1478_v44  ;;  %3505 = vmatmul.mubr.msk.bf16.vlgmr.msra.gmra.mrb[132].mxu0 %vm287_vm2, %v1737_v29  ;;  %v1479_v16 = vrot.slane %v4502_v41, 6  ;;  %v1738_v26 = vrot.slane %v4502_v41, 2 }
 0x11b   :  { %3617 = vmatpush3.bf16.msra.mxu0 %v3730_v59  ;;  %3452 = vmatprep.mubr.msk.bf16.mxu1 %vm3751_vm0, %v5222_v46 }
 0x11c   :  { %3508 = vmatprep.mubr.msk.bf16.mxu0 %vm3751_vm0, %v5222_v46  ;;  %3618 = vmatprep.subr.bf16.mxu0 %v5222_v46  ;;  %v1480_v27 = vsel %vm1473_vm7, %v1477_v0, %v1479_v16  ;;  %v1739_v14 = vsel %vm1734_vm8, %v1736_v2, %v1738_v26 }
 0x11d   :  { %v555_v44 = vpop.f32.mrb[28].mxu1  ;;  %v782_v59 = vpop.f32.mrb[28].mxu0  ;;  %3561 = vmatpush3.bf16.msra.mxu1 %v3733_v63 }
 0x11e   :  { %v556_v62 = vadd.f32 %v555_v44, %v4358_v42  ;;  %v4516_v34 = vadd.f32 %v782_v59, %v548_v19  ;;  %v3210_v61 = vpop.f32.mrb[29].mxu1  ;;  %v3266_v54 = vpop.f32.mrb[29].mxu0  ;;  %3562 = vmatprep.subr.bf16.mxu1 %v5222_v46  ;;  %v3734_v42 = vld [vmem:[%s5185_s2 + $0x110] sm:$0xff]  }
 0x11f   :  { %v558_v22 = vpop.f32.mrb[30].mxu1  ;;  %v785_v29 = vpop.f32.mrb[30].mxu0  ;;  %3619 = vmatpush3.bf16.msra.mxu0 %v3732_v18 }
 0x120   :  { %v559_v63 = vadd.f32 %v558_v22, %v4362_v49  ;;  %v4522_v15 = vadd.f32 %v785_v29, %v551_v28  ;;  %v3267_v36 = vpop.f32.mrb[31].mxu0  ;;  %v3211_v51 = vpop.f32.mrb[31].mxu1  ;;  %3620 = vmatprep.subr.bf16.mxu0 %v5222_v46  ;;  %v1481_v28 = vrot.slane %v3932_v47, 6 }
 0x121   :  { %3563 = vmatpush3.bf16.msra.mxu1 %v3735_v32  ;;  %v1740_v36 = vrot.slane %v3932_v47, 2  ;;  %v3736_v51 = vld [vmem:[%s5185_s2 + $0x118] sm:$0xff]  }
 0x122   :  { %3453 = vmatmul.mubr.msk.bf16.gmra.mrb[136].mxu1 %vm287_vm2, %v1480_v27  ;;  %3509 = vmatmul.mubr.msk.bf16.gmra.mrb[136].mxu0 %vm287_vm2, %v1739_v14  ;;  %v1482_v59 = vsel %vm1473_vm7, %v1479_v16, %v1481_v28  ;;  %v1742_v16 = vrot.slane %v3989_v11, 2 }
 0x123   :  { %3456 = vmatprep.mubr.msk.bf16.mxu1 %vm3751_vm0, %v5222_v46  ;;  %3512 = vmatprep.mubr.msk.bf16.mxu0 %vm3751_vm0, %v5222_v46  ;;  %v1741_v47 = vsel %vm1734_vm8, %v1738_v26, %v1740_v36 }
 0x124   :  { %3621 = vmatpush3.bf16.msra.mxu0 %v3734_v42 }
 0x125   :  { %v563_v49 = vpop.f32.mrb[32].mxu1  ;;  %v790_v0 = vpop.f32.mrb[32].mxu0  ;;  %3622 = vmatprep.subr.bf16.mxu0 %v5222_v46 }
 0x126   :  { %v564_v14 = vadd.f32 %v563_v49, %v4377_v33  ;;  %v4541_v27 = vadd.f32 %v790_v0, %v556_v62  ;;  %v3214_v2 = vpop.f32.mrb[33].mxu1  ;;  %v3270_v19 = vpop.f32.mrb[33].mxu0  ;;  %v1483_v33 = vrot.slane %v3989_v11, 6 }
 0x127   :  { %v566_v18 = vpop.f32.mrb[34].mxu1  ;;  %v793_v44 = vpop.f32.mrb[34].mxu0  ;;  %v1743_v2 = vsel %vm1734_vm8, %v1740_v36, %v1742_v16 }
 0x128   :  { %v567_v32 = vadd.f32 %v566_v18, %v4381_v10  ;;  %v4546_v61 = vadd.f32 %v793_v44, %v559_v63  ;;  %v3271_v54 = vpop.f32.mrb[35].mxu0  ;;  %v3215_v22 = vpop.f32.mrb[35].mxu1  ;;  %3623 = vmatpush3.bf16.msra.mxu0 %v3736_v51  ;;  %v1484_v0 = vsel %vm1473_vm7, %v1481_v28, %v1483_v33  ;;  %v1744_v28 = vrot.slane %v4019_v30, 2 }
 0x12a   :  { %3457 = vmatmul.mubr.msk.bf16.gmra.mrb[140].mxu1 %vm287_vm2, %v1482_v59  ;;  %3513 = vmatmul.mubr.msk.bf16.gmra.mrb[140].mxu0 %vm287_vm2, %v1741_v47 }
 0x12b   :  { %3460 = vmatprep.mubr.msk.bf16.mxu1 %vm3751_vm0, %v5222_v46  ;;  %3516 = vmatprep.mubr.msk.bf16.mxu0 %vm3751_vm0, %v5222_v46 }
 0x12d   :  { %v571_v10 = vpop.f32.mrb[36].mxu1  ;;  %v798_v26 = vpop.f32.mrb[36].mxu0 }
 0x12e   :  { %v572_v62 = vadd.f32 %v571_v10, %v4396_v38  ;;  %v4557_v29 = vadd.f32 %v798_v26, %v564_v14  ;;  %v3218_v63 = vpop.f32.mrb[37].mxu1  ;;  %v3274_v42 = vpop.f32.mrb[37].mxu0  ;;  %v1485_v38 = vrot.slane %v4019_v30, 6  ;;  %v1745_v26 = vsel %vm1734_vm8, %v1742_v16, %v1744_v28 }
 0x12f   :  { %v574_v51 = vpop.f32.mrb[38].mxu1  ;;  %v801_v49 = vpop.f32.mrb[38].mxu0 }
 0x130   :  { %v575_v19 = vadd.f32 %v574_v51, %v4400_v17  ;;  %v4562_v18 = vadd.f32 %v801_v49, %v567_v32  ;;  %v3275_v44 = vpop.f32.mrb[39].mxu0  ;;  %v3219_v11 = vpop.f32.mrb[39].mxu1  ;;  %v1486_v10 = vsel %vm1473_vm7, %v1483_v33, %v1485_v38 }
 0x132   :  { %3461 = vmatmul.mubr.msk.bf16.gmra.mrb[144].mxu1 %vm287_vm2, %v1484_v0  ;;  %3517 = vmatmul.mubr.msk.bf16.gmra.mrb[144].mxu0 %vm287_vm2, %v1743_v2 }
 0x133   :  { %3464 = vmatprep.mubr.msk.bf16.mxu1 %vm3751_vm0, %v5222_v46  ;;  %3520 = vmatprep.mubr.msk.bf16.mxu0 %vm3751_vm0, %v5222_v46 }
 0x135   :  { %v579_v36 = vpop.f32.mrb[40].mxu1  ;;  %v806_v17 = vpop.f32.mrb[40].mxu0 }
 0x136   :  { %v580_v14 = vadd.f32 %v579_v36, %v4422_v23  ;;  %v4573_v59 = vadd.f32 %v806_v17, %v572_v62  ;;  %v3222_v47 = vpop.f32.mrb[41].mxu1  ;;  %v3278_v32 = vpop.f32.mrb[41].mxu0  ;;  %v4589_v23 = vld [vmem:[%s5186_s0 + $0x38] sm:$0xff]  }
 0x137   :  { %v582_v54 = vpop.f32.mrb[42].mxu1  ;;  %v809_v22 = vpop.f32.mrb[42].mxu0  ;;  %v1746_v33 = vrot.slane %v4589_v23, 2 }
 0x138   :  { %v583_v63 = vadd.f32 %v582_v54, %v4426_v5  ;;  %v4578_v42 = vadd.f32 %v809_v22, %v575_v19  ;;  %v3279_v51 = vpop.f32.mrb[43].mxu0  ;;  %v3223_v30 = vpop.f32.mrb[43].mxu1  ;;  %v1487_v5 = vrot.slane %v4589_v23, 6 }
 0x139   :  { %v1747_v17 = vsel %vm1734_vm8, %v1744_v28, %v1746_v33 }
 0x13a   :  { %3465 = vmatmul.mubr.msk.bf16.gmra.mrb[148].mxu1 %vm287_vm2, %v1486_v10  ;;  %3521 = vmatmul.mubr.msk.bf16.gmra.mrb[148].mxu0 %vm287_vm2, %v1745_v26  ;;  %v1488_v36 = vsel %vm1473_vm7, %v1485_v38, %v1487_v5 }
 0x13b   :  { %3468 = vmatprep.mubr.msk.bf16.mxu1 %vm3751_vm0, %v5222_v46  ;;  %3524 = vmatprep.mubr.msk.bf16.mxu0 %vm3751_vm0, %v5222_v46 }
 0x13d   :  { %v587_v16 = vpop.f32.mrb[44].mxu1  ;;  %v814_v62 = vpop.f32.mrb[44].mxu0 }
 0x13e   :  { %v588_v49 = vadd.f32 %v587_v16, %v4451_v48  ;;  %v4594_v0 = vadd.f32 %v814_v62, %v580_v14  ;;  %v3226_v2 = vpop.f32.mrb[45].mxu1  ;;  %v3282_v19 = vpop.f32.mrb[45].mxu0  ;;  %v4610_v48 = vld [vmem:[%s5186_s0 + $0x40] sm:$0xff]  }
 0x13f   :  { %v590_v44 = vpop.f32.mrb[46].mxu1  ;;  %v817_v11 = vpop.f32.mrb[46].mxu0  ;;  %v1748_v38 = vrot.slane %v4610_v48, 2 }
 0x140   :  { %v591_v47 = vadd.f32 %v590_v44, %v4455_v37  ;;  %v4599_v32 = vadd.f32 %v817_v11, %v583_v63  ;;  %v3283_v54 = vpop.f32.mrb[47].mxu0  ;;  %v3227_v22 = vpop.f32.mrb[47].mxu1  ;;  %v1489_v37 = vrot.slane %v4610_v48, 6 }
 0x141   :  { %v1749_v2 = vsel %vm1734_vm8, %v1746_v33, %v1748_v38 }
 0x142   :  { %3469 = vmatmul.mubr.msk.bf16.gmra.mrb[152].mxu1 %vm287_vm2, %v1488_v36  ;;  %3525 = vmatmul.mubr.msk.bf16.gmra.mrb[152].mxu0 %vm287_vm2, %v1747_v17  ;;  %v1490_v62 = vsel %vm1473_vm7, %v1487_v5, %v1489_v37 }
 0x143   :  { %3472 = vmatprep.mubr.msk.bf16.mxu1 %vm3751_vm0, %v5222_v46  ;;  %3528 = vmatprep.mubr.msk.bf16.mxu0 %vm3751_vm0, %v5222_v46 }
 0x145   :  { %v595_v28 = vpop.f32.mrb[48].mxu1  ;;  %v822_v14 = vpop.f32.mrb[48].mxu0 }
 0x146   :  { %v596_v10 = vadd.f32 %v595_v28, %v4479_v9  ;;  %v4615_v26 = vadd.f32 %v822_v14, %v588_v49  ;;  %v3230_v63 = vpop.f32.mrb[49].mxu1  ;;  %v3286_v51 = vpop.f32.mrb[49].mxu0  ;;  %v4631_v9 = vld [vmem:[%s5186_s0 + $0x48] sm:$0xff]  }
 0x147   :  { %v598_v30 = vpop.f32.mrb[50].mxu1  ;;  %v825_v16 = vpop.f32.mrb[50].mxu0  ;;  %v1750_v5 = vrot.slane %v4631_v9, 2 }
 0x148   :  { %v599_v19 = vadd.f32 %v598_v30, %v4483_v60  ;;  %v4620_v44 = vadd.f32 %v825_v16, %v591_v47  ;;  %v3287_v11 = vpop.f32.mrb[51].mxu0  ;;  %v3231_v36 = vpop.f32.mrb[51].mxu1  ;;  %v1491_v60 = vrot.slane %v4631_v9, 6 }
 0x149   :  { %v1751_v51 = vsel %vm1734_vm8, %v1748_v38, %v1750_v5 }
 0x14a   :  { %3473 = vmatmul.mubr.msk.bf16.gmra.mrb[156].mxu1 %vm287_vm2, %v1490_v62  ;;  %3529 = vmatmul.mubr.msk.bf16.gmra.mrb[156].mxu0 %vm287_vm2, %v1749_v2  ;;  %v1492_v63 = vsel %vm1473_vm7, %v1489_v37, %v1491_v60 }
 0x14b   :  { %3476 = vmatprep.mubr.msk.bf16.mxu1 %vm3751_vm0, %v5222_v46  ;;  %3532 = vmatprep.mubr.msk.bf16.mxu0 %vm3751_vm0, %v5222_v46 }
 0x14d   :  { %v603_v33 = vpop.f32.mrb[52].mxu1  ;;  %v830_v49 = vpop.f32.mrb[52].mxu0 }
 0x14e   :  { %v604_v17 = vadd.f32 %v603_v33, %v4341_v1  ;;  %v4636_v47 = vadd.f32 %v830_v49, %v596_v10  ;;  %v3234_v54 = vpop.f32.mrb[53].mxu1  ;;  %v3290_v22 = vpop.f32.mrb[53].mxu0  ;;  %v4652_v1 = vld [vmem:[%s5186_s0 + $0x50] sm:$0xff]  }
 0x14f   :  { %v606_v28 = vpop.f32.mrb[54].mxu1  ;;  %v833_v14 = vpop.f32.mrb[54].mxu0  ;;  %v1752_v37 = vrot.slane %v4652_v1, 2 }
 0x150   :  { %v607_v30 = vadd.f32 %v606_v28, %v4347_v7  ;;  %v4641_v16 = vadd.f32 %v833_v14, %v599_v19  ;;  %v3291_v62 = vpop.f32.mrb[55].mxu0  ;;  %v3235_v2 = vpop.f32.mrb[55].mxu1  ;;  %v1493_v7 = vrot.slane %v4652_v1, 6 }
 0x151   :  { %v1753_v28 = vsel %vm1734_vm8, %v1750_v5, %v1752_v37 }
 0x152   :  { %3477 = vmatmul.mubr.msk.bf16.gmra.mrb[160].mxu1 %vm287_vm2, %v1492_v63  ;;  %3533 = vmatmul.mubr.msk.bf16.gmra.mrb[160].mxu0 %vm287_vm2, %v1751_v51  ;;  %v1494_v22 = vsel %vm1473_vm7, %v1491_v60, %v1493_v7 }
 0x153   :  { %3480 = vmatprep.mubr.msk.bf16.mxu1 %vm3751_vm0, %v5222_v46  ;;  %3536 = vmatprep.mubr.msk.bf16.mxu0 %vm3751_vm0, %v5222_v46 }
 0x155   :  { %v611_v38 = vpop.f32.mrb[56].mxu1  ;;  %v838_v10 = vpop.f32.mrb[56].mxu0 }
 0x156   :  { %v612_v19 = vadd.f32 %v611_v38, %v4360_v45  ;;  %v4657_v11 = vadd.f32 %v838_v10, %v604_v17  ;;  %v3238_v36 = vpop.f32.mrb[57].mxu1  ;;  %v3294_v33 = vpop.f32.mrb[57].mxu0  ;;  %v4673_v45 = vld [vmem:[%s5186_s0 + $0x58] sm:$0xff]  }
 0x157   :  { %v614_v49 = vpop.f32.mrb[58].mxu1  ;;  %v841_v54 = vpop.f32.mrb[58].mxu0  ;;  %v1754_v60 = vrot.slane %v4673_v45, 2 }
 0x158   :  { %v615_v14 = vadd.f32 %v614_v49, %v4366_v13  ;;  %v4662_v63 = vadd.f32 %v841_v54, %v607_v30  ;;  %v3295_v51 = vpop.f32.mrb[59].mxu0  ;;  %v3239_v62 = vpop.f32.mrb[59].mxu1  ;;  %v1495_v13 = vrot.slane %v4673_v45, 6 }
 0x159   :  { %v1755_v54 = vsel %vm1734_vm8, %v1752_v37, %v1754_v60 }
 0x15a   :  { %3481 = vmatmul.mubr.msk.bf16.gmra.mrb[164].mxu1 %vm287_vm2, %v1494_v22  ;;  %3537 = vmatmul.mubr.msk.bf16.gmra.mrb[164].mxu0 %vm287_vm2, %v1753_v28  ;;  %v1496_v49 = vsel %vm1473_vm7, %v1493_v7, %v1495_v13  ;;  %v1756_v7 = vrot.slane %v3991_v12, 2 }
 0x15b   :  { %3484 = vmatprep.mubr.msk.bf16.mxu1 %vm3751_vm0, %v5222_v46  ;;  %3540 = vmatprep.mubr.msk.bf16.mxu0 %vm3751_vm0, %v5222_v46 }
 0x15d   :  { %v619_v5 = vpop.f32.mrb[60].mxu1  ;;  %v846_v17 = vpop.f32.mrb[60].mxu0 }
 0x15e   :  { %v620_v30 = vadd.f32 %v619_v5, %v4379_v58  ;;  %v4678_v2 = vadd.f32 %v846_v17, %v612_v19  ;;  %v3242_v38 = vpop.f32.mrb[61].mxu1  ;;  %v3298_v10 = vpop.f32.mrb[61].mxu0  ;;  %v1497_v58 = vrot.slane %v3991_v12, 6 }
 0x15f   :  { %v622_v36 = vpop.f32.mrb[62].mxu1  ;;  %v849_v33 = vpop.f32.mrb[62].mxu0 }
 0x160   :  { %v623_v22 = vadd.f32 %v622_v36, %v4385_v3  ;;  %v4683_v28 = vadd.f32 %v849_v33, %v615_v14  ;;  %v3299_v51 = vpop.f32.mrb[63].mxu0  ;;  %v3243_v62 = vpop.f32.mrb[63].mxu1  ;;  %v1498_v36 = vsel %vm1473_vm7, %v1495_v13, %v1497_v58  ;;  %v1757_v33 = vsel %vm1734_vm8, %v1754_v60, %v1756_v7 }
 0x162   :  { %3485 = vmatmul.mubr.msk.bf16.gmra.mrb[168].mxu1 %vm287_vm2, %v1496_v49  ;;  %3541 = vmatmul.mubr.msk.bf16.gmra.mrb[168].mxu0 %vm287_vm2, %v1755_v54 }
 0x163   :  { %3488 = vmatprep.mubr.msk.bf16.mxu1 %vm3751_vm0, %v5222_v46  ;;  %3544 = vmatprep.mubr.msk.bf16.mxu0 %vm3751_vm0, %v5222_v46 }
 0x165   :  { %v627_v37 = vpop.f32.mrb[64].mxu1  ;;  %v854_v3 = vpop.f32.mrb[64].mxu0 }
 0x166   :  { %v628_v19 = vadd.f32 %v627_v37, %v4398_v4  ;;  %v4694_v14 = vadd.f32 %v854_v3, %v620_v30  ;;  %v3246_v5 = vpop.f32.mrb[65].mxu1  ;;  %v3302_v17 = vpop.f32.mrb[65].mxu0  ;;  %v1499_v4 = vrot.slane %v4409_v43, 6  ;;  %v1758_v30 = vrot.slane %v4409_v43, 2 }
 0x167   :  { %v630_v38 = vpop.f32.mrb[66].mxu1  ;;  %v857_v10 = vpop.f32.mrb[66].mxu0 }
 0x168   :  { %v631_v49 = vadd.f32 %v630_v38, %v4404_v6  ;;  %v4699_v54 = vadd.f32 %v857_v10, %v623_v22  ;;  %v3303_v51 = vpop.f32.mrb[67].mxu0  ;;  %v3247_v62 = vpop.f32.mrb[67].mxu1  ;;  %v1500_v5 = vsel %vm1473_vm7, %v1497_v58, %v1499_v4  ;;  %v1759_v17 = vsel %vm1734_vm8, %v1756_v7, %v1758_v30 }
 0x169   :  { %v1997_v51 = vrot.slane %v3905_v39, 2  ;;  %v1998_v62 = vrot.slane %v3859_v24, 3 }
 0x16a   :  { %3489 = vmatmul.mubr.msk.bf16.gmra.mrb[172].mxu1 %vm287_vm2, %v1498_v36  ;;  %3545 = vmatmul.mubr.msk.bf16.gmra.mrb[172].mxu0 %vm287_vm2, %v1757_v33  ;;  %v1994_v36 = vrot.slane %v3848_v21, 2  ;;  %v1995_v33 = vrot.slane %v3809_v8, 3 }
 0x16b   :  { %3492 = vmatprep.mubr.msk.bf16.mxu1 %vm3751_vm0, %v5222_v46  ;;  %3548 = vmatprep.mubr.msk.bf16.mxu0 %vm3751_vm0, %v5222_v46  ;;  %v1999_v21 = vor.u32 %v1998_v62, %v1997_v51 }
 0x16c   :  { %v1996_v8 = vor.u32 %v1995_v33, %v1994_v36 }
 0x16d   :  { %v635_v13 = vpop.f32.mrb[68].mxu1  ;;  %v862_v6 = vpop.f32.mrb[68].mxu0 }
 0x16e   :  { %v636_v60 = vadd.f32 %v635_v13, %v4424_v31  ;;  %v4710_v22 = vadd.f32 %v862_v6, %v628_v19  ;;  %v3250_v37 = vpop.f32.mrb[69].mxu1  ;;  %v3306_v3 = vpop.f32.mrb[69].mxu0 }
 0x16f   :  { %v638_v38 = vpop.f32.mrb[70].mxu1  ;;  %v865_v10 = vpop.f32.mrb[70].mxu0  ;;  %v2000_v37 = vsel %vm1993_vm9, %v1996_v8, %v1999_v21 }
 0x170   :  { %v639_v31 = vadd.f32 %v638_v38, %v4430_v53  ;;  %v4719_v19 = vadd.f32 %v865_v10, %v631_v49  ;;  %v3307_v13 = vpop.f32.mrb[71].mxu0  ;;  %v3251_v6 = vpop.f32.mrb[71].mxu1 }
 0x172   :  { %3493 = vmatmul.mubr.msk.bf16.gmra.mrb[176].mxu1 %vm287_vm2, %v1500_v5  ;;  %3549 = vmatmul.mubr.msk.bf16.gmra.mrb[176].mxu0 %vm287_vm2, %v1759_v17  ;;  %v2001_v5 = vrot.slane %v3956_v55, 2  ;;  %v2002_v17 = vrot.slane %v3909_v40, 3  ;;  %v2280_v55 = vrot.slane %v4471_v57, 3 }
 0x173   :  { %3552 = vmatprep.mubr.msk.bf16.mxu0 %vm3751_vm0, %v5222_v46  ;;  %3564 = vmatprep.mubr.msk.bf16.mxu1 %vm3751_vm0, %v5222_v46 }
 0x175   :  { %v643_v24 = vpop.f32.mrb[72].mxu1  ;;  %v870_v39 = vpop.f32.mrb[72].mxu0 }
 0x176   :  { %v644_v53 = vadd.f32 %v643_v24, %v4453_v50  ;;  %v4728_v58 = vadd.f32 %v870_v39, %v636_v60  ;;  %v3310_v7 = vpop.f32.mrb[73].mxu0  ;;  %v3254_v49 = vpop.f32.mrb[73].mxu1  ;;  %v2003_v50 = vor.u32 %v2002_v17, %v2001_v5  ;;  %v2279_v60 = vrot.slane %v4448_v52, 3 }
 0x177   :  { %v873_v4 = vpop.f32.mrb[74].mxu0  ;;  %v646_v3 = vpop.f32.mrb[74].mxu1  ;;  %v2005_v39 = vrot.slane %v4000_v20, 2  ;;  %v2006_v52 = vrot.slane %v3959_v56, 3 }
 0x178   :  { %v4733_v38 = vadd.f32 %v873_v4, %v639_v31  ;;  %v3311_v10 = vpop.f32.mrb[75].mxu0  ;;  %v3255_v36 = vpop.f32.mrb[75].mxu1  ;;  %v2004_v8 = vsel %vm1993_vm9, %v1999_v21, %v2003_v50  ;;  %v2281_v24 = vsel %vm2278_vm10, %v2279_v60, %v2280_v55  ;;  %v2282_v21 = vrot.slane %v4502_v41, 3 }
 0x179   :  { %v2009_v36 = vrot.slane %v4032_v35, 2  ;;  %v2010_v60 = vrot.slane %v4004_v25, 3  ;;  %v3746_v25 = vld [vmem:[%s5186_s0 + $0x20] sm:$0xff]  }
 0x17a   :  { %3553 = vmatmul.mubr.msk.bf16.gmra.mrb[180].mxu0 %vm287_vm2, %v1758_v30  ;;  %3565 = vmatmul.mubr.msk.bf16.vlgmr.msra.gmra.mrb[180].mxu1 %vm287_vm2, %v2000_v37  ;;  %v2283_v10 = vsel %vm2278_vm10, %v2280_v55, %v2282_v21  ;;  %v2284_v35 = vrot.slane %v3746_v25, 3 }
 0x17b   :  { %3568 = vmatprep.mubr.msk.bf16.mxu1 %vm3751_vm0, %v5222_v46  ;;  %3624 = vmatprep.mubr.msk.bf16.mxu0 %vm3751_vm0, %v5222_v46 }
 0x17d   :  { %v878_v40 = vpop.f32.mrb[76].mxu0  ;;  %v1043_v33 = vpop.f32.mrb[76].mxu1 }
 0x17e   :  { %v4743_v51 = vadd.f32 %v878_v40, %v644_v53  ;;  %v1145_v30 = vadd.f32 %v1043_v33, %v4516_v34  ;;  %v3314_v62 = vpop.f32.mrb[77].mxu0  ;;  %v3326_v31 = vpop.f32.mrb[77].mxu1  ;;  %v2007_v34 = vor.u32 %v2006_v52, %v2005_v39  ;;  %v2285_v39 = vsel %vm2278_vm10, %v2282_v21, %v2284_v35  ;;  %v5223_v52 = vld [vmem:[#allocation15_spill] sm:$0xff] }
 0x17f   :  { %v881_v13 = vpop.f32.mrb[78].mxu0  ;;  %v1046_v6 = vpop.f32.mrb[78].mxu1  ;;  %v3747_v21 = vld [vmem:[%s5186_s0 + $0x28] sm:$0xff]  }
 0x180   :  { %v1146_v57 = vadd.f32 %v1046_v6, %v4522_v15  ;;  %v3315_v7 = vpop.f32.mrb[79].mxu0  ;;  %v3327_v49 = vpop.f32.mrb[79].mxu1  ;;  %v2008_v17 = vsel %vm1993_vm9, %v2003_v50, %v2007_v34  ;;  %v2011_v50 = vor.u32 %v2010_v60, %v2009_v36 }
 0x181   :  { %v5224_v7 = vld [vmem:[#allocation13_spill] sm:$0xff] }
 0x182   :  { %3569 = vmatmul.mubr.msk.bf16.gmra.mrb[184].mxu1 %vm287_vm2, %v2004_v8  ;;  %3625 = vmatmul.mubr.msk.bf16.vlgmr.msra.gmra.mrb[184].mxu0 %vm287_vm2, %v2281_v24  ;;  %v2012_v24 = vsel %vm1993_vm9, %v2007_v34, %v2011_v50  ;;  %v2014_v49 = vrot.slane %v5224_v7, 3 }
 0x183   :  { %3572 = vmatprep.mubr.msk.bf16.mxu1 %vm3751_vm0, %v5222_v46  ;;  %3628 = vmatprep.mubr.msk.bf16.mxu0 %vm3751_vm0, %v5222_v46 }
 0x185   :  { %v1051_v20 = vpop.f32.mrb[80].mxu1  ;;  %v1337_v53 = vpop.f32.mrb[80].mxu0 }
 0x186   :  { %v1147_v56 = vadd.f32 %v1051_v20, %v4541_v27  ;;  %v4759_v15 = vadd.f32 %v1337_v53, %v1145_v30  ;;  %v3330_v4 = vpop.f32.mrb[81].mxu1  ;;  %v3386_v37 = vpop.f32.mrb[81].mxu0 }
 0x187   :  { %v1054_v3 = vpop.f32.mrb[82].mxu1  ;;  %v1340_v5 = vpop.f32.mrb[82].mxu0 }
 0x188   :  { %v1148_v41 = vadd.f32 %v1054_v3, %v4546_v61  ;;  %v4766_v40 = vadd.f32 %v1340_v5, %v1146_v57  ;;  %v3387_v33 = vpop.f32.mrb[83].mxu0  ;;  %v3331_v27 = vpop.f32.mrb[83].mxu1  ;;  %v2013_v57 = vrot.slane %v5223_v52, 2 }
 0x189   :  { %v5225_v27 = vld [vmem:[#allocation3_spill] sm:$0xff] }
 0x18a   :  { %3573 = vmatmul.mubr.msk.bf16.gmra.mrb[188].mxu1 %vm287_vm2, %v2008_v17  ;;  %3629 = vmatmul.mubr.msk.bf16.gmra.mrb[188].mxu0 %vm287_vm2, %v2283_v10  ;;  %v2015_v34 = vor.u32 %v2014_v49, %v2013_v57  ;;  %v2017_v25 = vrot.slane %v5225_v27, 2 }
 0x18b   :  { %3576 = vmatprep.mubr.msk.bf16.mxu1 %vm3751_vm0, %v5222_v46  ;;  %3632 = vmatprep.mubr.msk.bf16.mxu0 %vm3751_vm0, %v5222_v46 }
 0x18d   :  { %v1059_v61 = vpop.f32.mrb[84].mxu1  ;;  %v1345_v55 = vpop.f32.mrb[84].mxu0 }
 0x18e   :  { %v1149_v30 = vadd.f32 %v1059_v61, %v4557_v29  ;;  %v4778_v62 = vadd.f32 %v1345_v55, %v1147_v56  ;;  %v3334_v31 = vpop.f32.mrb[85].mxu1  ;;  %v3390_v13 = vpop.f32.mrb[85].mxu0  ;;  %v5226_v61 = vld [vmem:[#allocation2_spill] sm:$0xff] }
 0x18f   :  { %v1062_v6 = vpop.f32.mrb[86].mxu1  ;;  %v1348_v8 = vpop.f32.mrb[86].mxu0  ;;  %v2018_v55 = vrot.slane %v5226_v61, 3 }
 0x190   :  { %v1150_v20 = vadd.f32 %v1062_v6, %v4562_v18  ;;  %v4785_v53 = vadd.f32 %v1348_v8, %v1148_v41  ;;  %v3391_v4 = vpop.f32.mrb[87].mxu0  ;;  %v3335_v29 = vpop.f32.mrb[87].mxu1  ;;  %v2286_v18 = vrot.slane %v3747_v21, 3  ;;  %v2016_v41 = vsel %vm1993_vm9, %v2011_v50, %v2015_v34 }
 0x191   :  { %v2019_v50 = vor.u32 %v2018_v55, %v2017_v25  ;;  %v5227_v29 = vld [vmem:[#allocation5_spill] sm:$0xff] }
 0x192   :  { %3577 = vmatmul.mubr.msk.bf16.gmra.mrb[192].mxu1 %vm287_vm2, %v2012_v24  ;;  %3633 = vmatmul.mubr.msk.bf16.gmra.mrb[192].mxu0 %vm287_vm2, %v2285_v39  ;;  %v2287_v33 = vsel %vm2278_vm10, %v2284_v35, %v2286_v18  ;;  %v3748_v35 = vld [vmem:[%s5186_s0 + $0x30] sm:$0xff]   ;;  %v2021_v21 = vrot.slane %v5227_v29, 2 }
 0x193   :  { %3580 = vmatprep.mubr.msk.bf16.mxu1 %vm3751_vm0, %v5222_v46  ;;  %3636 = vmatprep.mubr.msk.bf16.mxu0 %vm3751_vm0, %v5222_v46 }
 0x195   :  { %v1067_v56 = vpop.f32.mrb[88].mxu1  ;;  %v1353_v37 = vpop.f32.mrb[88].mxu0 }
 0x196   :  { %v1151_v3 = vadd.f32 %v1067_v56, %v4573_v59  ;;  %v4797_v5 = vadd.f32 %v1353_v37, %v1149_v30  ;;  %v3338_v17 = vpop.f32.mrb[89].mxu1  ;;  %v3394_v10 = vpop.f32.mrb[89].mxu0  ;;  %v5228_v56 = vld [vmem:[#allocation4_spill] sm:$0xff] }
 0x197   :  { %v1070_v36 = vpop.f32.mrb[90].mxu1  ;;  %v1356_v60 = vpop.f32.mrb[90].mxu0  ;;  %v2022_v37 = vrot.slane %v5228_v56, 3 }
 0x198   :  { %v1152_v31 = vadd.f32 %v1070_v36, %v4578_v42  ;;  %v4804_v13 = vadd.f32 %v1356_v60, %v1150_v20  ;;  %v3395_v6 = vpop.f32.mrb[91].mxu0  ;;  %v3339_v59 = vpop.f32.mrb[91].mxu1  ;;  %v2288_v42 = vrot.slane %v3748_v35, 3  ;;  %v2020_v20 = vsel %vm1993_vm9, %v2015_v34, %v2019_v50  ;;  %v5230_v35 = vld [vmem:[#allocation6_spill] sm:$0xff] }
 0x199   :  { %v2023_v34 = vor.u32 %v2022_v37, %v2021_v21  ;;  %v5229_v6 = vld [vmem:[#allocation7_spill] sm:$0xff]  ;;  %v5231_v37 = vld [vmem:[#allocation9_spill] sm:$0xff] }
 0x19a   :  { %3581 = vmatmul.mubr.msk.bf16.gmra.mrb[196].mxu1 %vm287_vm2, %v2016_v41  ;;  %3637 = vmatmul.mubr.msk.bf16.gmra.mrb[196].mxu0 %vm287_vm2, %v2287_v33  ;;  %v2289_v4 = vsel %vm2278_vm10, %v2286_v18, %v2288_v42  ;;  %v2290_v18 = vrot.slane %v4589_v23, 3  ;;  %v2025_v59 = vrot.slane %v5229_v6, 2 }
 0x19b   :  { %3584 = vmatprep.mubr.msk.bf16.mxu1 %vm3751_vm0, %v5222_v46  ;;  %3640 = vmatprep.mubr.msk.bf16.mxu0 %vm3751_vm0, %v5222_v46  ;;  %v2024_v55 = vsel %vm1993_vm9, %v2019_v50, %v2023_v34 }
 0x19d   :  { %v1075_v30 = vpop.f32.mrb[92].mxu1  ;;  %v1361_v8 = vpop.f32.mrb[92].mxu0 }
 0x19e   :  { %v1153_v24 = vadd.f32 %v1075_v30, %v4594_v0  ;;  %v4816_v39 = vadd.f32 %v1361_v8, %v1151_v3  ;;  %v3342_v52 = vpop.f32.mrb[93].mxu1  ;;  %v3398_v57 = vpop.f32.mrb[93].mxu0  ;;  %v2026_v30 = vrot.slane %v5230_v35, 3  ;;  %v5233_v35 = vld [vmem:[#allocation11_spill] sm:$0xff] }
 0x19f   :  { %v1078_v7 = vpop.f32.mrb[94].mxu1  ;;  %v1364_v49 = vpop.f32.mrb[94].mxu0 }
 0x1a0   :  { %v1154_v17 = vadd.f32 %v1078_v7, %v4599_v32  ;;  %v4823_v10 = vadd.f32 %v1364_v49, %v1152_v31  ;;  %v3399_v36 = vpop.f32.mrb[95].mxu0  ;;  %v3343_v0 = vpop.f32.mrb[95].mxu1  ;;  %v2291_v31 = vsel %vm2278_vm10, %v2288_v42, %v2290_v18  ;;  %v2027_v50 = vor.u32 %v2026_v30, %v2025_v59 }
 0x1a1   :  { %v2292_v42 = vrot.slane %v4610_v48, 3  ;;  %v5232_v36 = vld [vmem:[#allocation8_spill] sm:$0xff]  ;;  %v2033_v30 = vrot.slane %v5233_v35, 2  ;;  %v5237_v35 = vshrl.u32 %v4409_v43, 16 }
 0x1a2   :  { %3585 = vmatmul.mubr.msk.bf16.gmra.mrb[200].mxu1 %vm287_vm2, %v2020_v20  ;;  %3641 = vmatmul.mubr.msk.bf16.gmra.mrb[200].mxu0 %vm287_vm2, %v2289_v4  ;;  %v2028_v21 = vsel %vm1993_vm9, %v2023_v34, %v2027_v50  ;;  %v2030_v0 = vrot.slane %v5232_v36, 3 }
 0x1a3   :  { %3588 = vmatprep.mubr.msk.bf16.mxu1 %vm3751_vm0, %v5222_v46  ;;  %3644 = vmatprep.mubr.msk.bf16.mxu0 %vm3751_vm0, %v5222_v46  ;;  %v2293_v56 = vsel %vm2278_vm10, %v2290_v18, %v2292_v42  ;;  %v2294_v18 = vrot.slane %v4631_v9, 3 }
 0x1a5   :  { %v1083_v3 = vpop.f32.mrb[96].mxu1  ;;  %v1369_v60 = vpop.f32.mrb[96].mxu0  ;;  %v2295_v59 = vsel %vm2278_vm10, %v2292_v42, %v2294_v18  ;;  %v2296_v42 = vrot.slane %v4652_v1, 3 }
 0x1a6   :  { %v1155_v32 = vadd.f32 %v1083_v3, %v4615_v26  ;;  %v4833_v41 = vadd.f32 %v1369_v60, %v1153_v24  ;;  %v3346_v33 = vpop.f32.mrb[97].mxu1  ;;  %v3402_v27 = vpop.f32.mrb[97].mxu0 }
 0x1a7   :  { %v1086_v25 = vpop.f32.mrb[98].mxu1  ;;  %v1372_v61 = vpop.f32.mrb[98].mxu0 }
 0x1a8   :  { %v1156_v23 = vadd.f32 %v1086_v25, %v4620_v44  ;;  %v4840_v8 = vadd.f32 %v1372_v61, %v1154_v17  ;;  %v3403_v52 = vpop.f32.mrb[99].mxu0  ;;  %v3347_v26 = vpop.f32.mrb[99].mxu1  ;;  %v2029_v17 = vrot.slane %v5231_v37, 2  ;;  %v2297_v37 = vsel %vm2278_vm10, %v2294_v18, %v2296_v42 }
 0x1a9   :  { %v2298_v18 = vrot.slane %v4673_v45, 3 }
 0x1aa   :  { %3589 = vmatmul.mubr.msk.bf16.gmra.mrb[204].mxu1 %vm287_vm2, %v2024_v55  ;;  %3645 = vmatmul.mubr.msk.bf16.gmra.mrb[204].mxu0 %vm287_vm2, %v2291_v31  ;;  %v2031_v34 = vor.u32 %v2030_v0, %v2029_v17  ;;  %v5235_v17 = vld [vmem:[#allocation14_spill] sm:$0xff]  ;;  %v5236_v0 = vld [vmem:[#allocation12_spill] sm:$0xff] }
 0x1ab   :  { %3592 = vmatprep.mubr.msk.bf16.mxu1 %vm3751_vm0, %v5222_v46  ;;  %3648 = vmatprep.mubr.msk.bf16.mxu0 %vm3751_vm0, %v5222_v46  ;;  %v2037_v36 = vrot.slane %v5235_v17, 2 }
 0x1ac   :  { %v2032_v6 = vsel %vm1993_vm9, %v2027_v50, %v2031_v34 }
 0x1ad   :  { %v1091_v24 = vpop.f32.mrb[100].mxu1  ;;  %v1377_v57 = vpop.f32.mrb[100].mxu0 }
 0x1ae   :  { %v1157_v44 = vadd.f32 %v1091_v24, %v4636_v47  ;;  %v4850_v7 = vadd.f32 %v1377_v57, %v1155_v32  ;;  %v3350_v49 = vpop.f32.mrb[101].mxu1  ;;  %v3406_v20 = vpop.f32.mrb[101].mxu0 }
 0x1af   :  { %v1094_v4 = vpop.f32.mrb[102].mxu1  ;;  %v1380_v29 = vpop.f32.mrb[102].mxu0 }
 0x1b0   :  { %v1158_v48 = vadd.f32 %v1094_v4, %v4641_v16  ;;  %v4857_v3 = vadd.f32 %v1380_v29, %v1156_v23  ;;  %v3407_v60 = vpop.f32.mrb[103].mxu0  ;;  %v3351_v47 = vpop.f32.mrb[103].mxu1  ;;  %v5234_v23 = vld [vmem:[#allocation10_spill] sm:$0xff] }
 0x1b1   :  { %v2034_v52 = vrot.slane %v5234_v23, 3  ;;  %v5238_v23 = vshll.u32 %v4409_v43, 16  ;;  %v2300_v43 = vrot.slane %v3991_v12, 3 }
 0x1b2   :  { %3593 = vmatmul.mubr.msk.bf16.gmra.mrb[208].mxu1 %vm287_vm2, %v2028_v21  ;;  %3649 = vmatmul.mubr.msk.bf16.gmra.mrb[208].mxu0 %vm287_vm2, %v2293_v56 }
 0x1b3   :  { %3596 = vmatprep.mubr.msk.bf16.mxu1 %vm3751_vm0, %v5222_v46  ;;  %3652 = vmatprep.mubr.msk.bf16.mxu0 %vm3751_vm0, %v5222_v46  ;;  %v2035_v50 = vor.u32 %v2034_v52, %v2033_v30  ;;  %v2041_v30 = vrot.slane %v5237_v35, 2  ;;  %v2042_v45 = vrot.slane %v5238_v23, 3 }
 0x1b5   :  { %v1099_v32 = vpop.f32.mrb[104].mxu1  ;;  %v1385_v33 = vpop.f32.mrb[104].mxu0  ;;  %v2036_v56 = vsel %vm1993_vm9, %v2031_v34, %v2035_v50 }
 0x1b6   :  { %v1159_v16 = vadd.f32 %v1099_v32, %v4657_v11  ;;  %v4867_v27 = vadd.f32 %v1385_v33, %v1157_v44  ;;  %v3354_v25 = vpop.f32.mrb[105].mxu1  ;;  %v3410_v61 = vpop.f32.mrb[105].mxu0 }
 0x1b7   :  { %v1102_v55 = vpop.f32.mrb[106].mxu1  ;;  %v1388_v31 = vpop.f32.mrb[106].mxu0 }
 0x1b8   :  { %v1160_v9 = vadd.f32 %v1102_v55, %v4662_v63  ;;  %v4874_v26 = vadd.f32 %v1388_v31, %v1158_v48  ;;  %v3411_v24 = vpop.f32.mrb[107].mxu0  ;;  %v3355_v11 = vpop.f32.mrb[107].mxu1  ;;  %v2038_v48 = vrot.slane %v5236_v0, 3 }
 0x1b9   :  { %v2043_v11 = vor.u32 %v2042_v45, %v2041_v30 }
 0x1ba   :  { %3597 = vmatmul.mubr.msk.bf16.gmra.mrb[212].mxu1 %vm287_vm2, %v2032_v6  ;;  %3653 = vmatmul.mubr.msk.bf16.gmra.mrb[212].mxu0 %vm287_vm2, %v2295_v59  ;;  %v2039_v34 = vor.u32 %v2038_v48, %v2037_v36  ;;  %v2299_v59 = vsel %vm2278_vm10, %v2296_v42, %v2298_v18 }
 0x1bb   :  { %3600 = vmatprep.mubr.msk.bf16.mxu1 %vm3751_vm0, %v5222_v46  ;;  %3656 = vmatprep.mubr.msk.bf16.mxu0 %vm3751_vm0, %v5222_v46 }
 0x1bc   :  { %v2040_v6 = vsel %vm1993_vm9, %v2035_v50, %v2039_v34 }
 0x1bd   :  { %v1107_v57 = vpop.f32.mrb[108].mxu1  ;;  %v1393_v44 = vpop.f32.mrb[108].mxu0 }
 0x1be   :  { %v1161_v63 = vadd.f32 %v1107_v57, %v4678_v2  ;;  %v4884_v49 = vadd.f32 %v1393_v44, %v1159_v16  ;;  %v3358_v20 = vpop.f32.mrb[109].mxu1  ;;  %v3414_v4 = vpop.f32.mrb[109].mxu0 }
 0x1bf   :  { %v1110_v29 = vpop.f32.mrb[110].mxu1  ;;  %v1396_v21 = vpop.f32.mrb[110].mxu0 }
 0x1c0   :  { %v1162_v1 = vadd.f32 %v1110_v29, %v4683_v28  ;;  %v4891_v60 = vadd.f32 %v1396_v21, %v1160_v9  ;;  %v3415_v47 = vpop.f32.mrb[111].mxu0  ;;  %v3359_v2 = vpop.f32.mrb[111].mxu1  ;;  %v2044_v29 = vsel %vm1993_vm9, %v2039_v34, %v2043_v11  ;;  %v2301_v21 = vsel %vm2278_vm10, %v2298_v18, %v2300_v43 }
 0x1c2   :  { %3601 = vmatmul.mubr.msk.bf16.gmra.mrb[216].mxu1 %vm287_vm2, %v2036_v56  ;;  %3657 = vmatmul.mubr.msk.bf16.gmra.mrb[216].mxu0 %vm287_vm2, %v2297_v37 }
 0x1c3   :  { %3604 = vmatprep.mubr.msk.bf16.mxu1 %vm3751_vm0, %v5222_v46  ;;  %3660 = vmatprep.mubr.msk.bf16.mxu0 %vm3751_vm0, %v5222_v46 }
 0x1c5   :  { %v1115_v32 = vpop.f32.mrb[112].mxu1  ;;  %v1401_v33 = vpop.f32.mrb[112].mxu0 }
 0x1c6   :  { %v1163_v28 = vadd.f32 %v1115_v32, %v4694_v14  ;;  %v4901_v16 = vadd.f32 %v1401_v33, %v1161_v63  ;;  %v3362_v25 = vpop.f32.mrb[113].mxu1  ;;  %v3418_v61 = vpop.f32.mrb[113].mxu0 }
 0x1c7   :  { %v1118_v55 = vpop.f32.mrb[114].mxu1  ;;  %v1404_v31 = vpop.f32.mrb[114].mxu0 }
 0x1c8   :  { %v1164_v52 = vadd.f32 %v1118_v55, %v4699_v54  ;;  %v4910_v9 = vadd.f32 %v1404_v31, %v1162_v1  ;;  %v3419_v14 = vpop.f32.mrb[115].mxu0  ;;  %v3363_v24 = vpop.f32.mrb[115].mxu1 }
 0x1ca   :  { %3605 = vmatmul.mubr.msk.bf16.gmra.mrb[220].mxu1 %vm287_vm2, %v2040_v6  ;;  %3661 = vmatmul.mubr.msk.bf16.gmra.mrb[220].mxu0 %vm287_vm2, %v2299_v59 }
 0x1cb   :  { %3608 = vmatprep.mubr.msk.bf16.mxu1 %vm3751_vm0, %v5222_v46  ;;  %3664 = vmatprep.mubr.msk.bf16.mxu0 %vm3751_vm0, %v5222_v46 }
 0x1cd   :  { %v1123_v50 = vpop.f32.mrb[116].mxu1  ;;  %v1409_v42 = vpop.f32.mrb[116].mxu0 }
 0x1ce   :  { %v1165_v54 = vadd.f32 %v1123_v50, %v4710_v22  ;;  %v4920_v57 = vadd.f32 %v1409_v42, %v1163_v28  ;;  %v3366_v44 = vpop.f32.mrb[117].mxu1  ;;  %v3422_v63 = vpop.f32.mrb[117].mxu0  ;;  %v3749_v22 = vld [vmem:[%s5187_s1 + $0x68] sm:$0xff]  }
 0x1cf   :  { %v1126_v20 = vpop.f32.mrb[118].mxu1  ;;  %v1412_v4 = vpop.f32.mrb[118].mxu0  ;;  %v2302_v36 = vrot.slane %v3749_v22, 3 }
 0x1d0   :  { %v1166_v56 = vadd.f32 %v1126_v20, %v4719_v19  ;;  %v4925_v37 = vadd.f32 %v1412_v4, %v1164_v52  ;;  %v3423_v17 = vpop.f32.mrb[119].mxu0  ;;  %v3367_v12 = vpop.f32.mrb[119].mxu1 }
 0x1d1   :  { %v2303_v32 = vsel %vm2278_vm10, %v2300_v43, %v2302_v36 }
 0x1d2   :  { %3609 = vmatmul.mubr.msk.bf16.gmra.mrb[224].mxu1 %vm287_vm2, %v2044_v29  ;;  %3665 = vmatmul.mubr.msk.bf16.gmra.mrb[224].mxu0 %vm287_vm2, %v2301_v21 }
 0x1d3   :  { %3612 = vmatprep.mubr.msk.bf16.mxu1 %vm3751_vm0, %v5222_v46  ;;  %3668 = vmatprep.mubr.msk.bf16.mxu0 %vm3751_vm0, %v5222_v46 }
 0x1d5   :  { %v1131_v19 = vpop.f32.mrb[120].mxu1  ;;  %v1417_v0 = vpop.f32.mrb[120].mxu0 }
 0x1d6   :  { %v1167_v48 = vadd.f32 %v1131_v19, %v4728_v58  ;;  %v4937_v1 = vadd.f32 %v1417_v0, %v1165_v54  ;;  %v3370_v47 = vpop.f32.mrb[121].mxu1  ;;  %v3426_v2 = vpop.f32.mrb[121].mxu0 }
 0x1d7   :  { %v1134_v34 = vpop.f32.mrb[122].mxu1  ;;  %v1420_v18 = vpop.f32.mrb[122].mxu0 }
 0x1d8   :  { %v1168_v33 = vadd.f32 %v1134_v34, %v4733_v38  ;;  %v4941_v28 = vadd.f32 %v1420_v18, %v1166_v56  ;;  %v3427_v25 = vpop.f32.mrb[123].mxu0  ;;  %v3371_v61 = vpop.f32.mrb[123].mxu1 }
 0x1da   :  { %3613 = vmatmul.mubr.msk.bf16.gmra.mrb[228].mxu1 %vm287_vm2, %v2043_v11  ;;  %3669 = vmatmul.mubr.msk.bf16.gmra.mrb[228].mxu0 %vm287_vm2, %v2303_v32 }
 0x1db   :  { %3672 = vmatprep.mubr.msk.bf16.mxu0 %vm3751_vm0, %v5222_v46 }
 0x1dd   :  { %v1139_v58 = vpop.f32.mrb[124].mxu1  ;;  %v1425_v55 = vpop.f32.mrb[124].mxu0 }
 0x1de   :  { %v1169_v31 = vadd.f32 %v1139_v58, %v4743_v51  ;;  %v4948_v6 = vadd.f32 %v1425_v55, %v1167_v48  ;;  %v3430_v59 = vpop.f32.mrb[125].mxu0  ;;  %v3374_v35 = vpop.f32.mrb[125].mxu1 }
 0x1df   :  { %v1428_v38 = vpop.f32.mrb[126].mxu0  ;;  %v1142_v30 = vpop.f32.mrb[126].mxu1 }
 0x1e0   :  { %v4950_v23 = vadd.f32 %v1428_v38, %v1168_v33  ;;  %v3431_v45 = vpop.f32.mrb[127].mxu0  ;;  %v3375_v52 = vpop.f32.mrb[127].mxu1 }
 0x1e2   :  { %3673 = vmatmul.mubr.msk.bf16.gmra.mrb[232].mxu0 %vm287_vm2, %v2302_v36 }
 0x1e5   :  { %v1433_v14 = vpop.f32.mrb[128].mxu0  ;;  %v1598_v24 = vpop.f32.mrb[128].mxu1 }
 0x1e6   :  { %v4953_v11 = vadd.f32 %v1433_v14, %v1169_v31  ;;  %v1700_v46 = vadd.f32 %v1598_v24, %v4759_v15  ;;  %v3434_v43 = vpop.f32.mrb[129].mxu0  ;;  %v3446_v51 = vpop.f32.mrb[129].mxu1 }
 0x1e7   :  { %v1436_v50 = vpop.f32.mrb[130].mxu0  ;;  %v1601_v42 = vpop.f32.mrb[130].mxu1 }
 0x1e8   :  { %v1701_v54 = vadd.f32 %v1601_v42, %v4766_v40  ;;  %v3435_v44 = vpop.f32.mrb[131].mxu0  ;;  %v3447_v63 = vpop.f32.mrb[131].mxu1 }
 0x1ed   :  { %v1606_v20 = vpop.f32.mrb[132].mxu1  ;;  %v1857_v4 = vpop.f32.mrb[132].mxu0 }
 0x1ee   :  { %v1702_v29 = vadd.f32 %v1606_v20, %v4778_v62  ;;  %v4958_v21 = vadd.f32 %v1857_v4, %v1700_v46  ;;  %v3450_v56 = vpop.f32.mrb[133].mxu1  ;;  %v3506_v17 = vpop.f32.mrb[133].mxu0 }
 0x1ef   :  { %v1609_v12 = vpop.f32.mrb[134].mxu1  ;;  %v1860_v22 = vpop.f32.mrb[134].mxu0 }
 0x1f0   :  { %v1703_v15 = vadd.f32 %v1609_v12, %v4785_v53  ;;  %v4961_v36 = vadd.f32 %v1860_v22, %v1701_v54  ;;  %v3507_v19 = vpop.f32.mrb[135].mxu0  ;;  %v3451_v0 = vpop.f32.mrb[135].mxu1 }
 0x1f5   :  { %v1614_v48 = vpop.f32.mrb[136].mxu1  ;;  %v1865_v40 = vpop.f32.mrb[136].mxu0 }
 0x1f6   :  { %v1704_v47 = vadd.f32 %v1614_v48, %v4797_v5  ;;  %v4964_v2 = vadd.f32 %v1865_v40, %v1702_v29  ;;  %v3454_v34 = vpop.f32.mrb[137].mxu1  ;;  %v3510_v62 = vpop.f32.mrb[137].mxu0 }
 0x1f7   :  { %v1617_v18 = vpop.f32.mrb[138].mxu1  ;;  %v1868_v32 = vpop.f32.mrb[138].mxu0 }
 0x1f8   :  { %v1705_v33 = vadd.f32 %v1617_v18, %v4804_v13  ;;  %v4967_v25 = vadd.f32 %v1868_v32, %v1703_v15  ;;  %v3511_v61 = vpop.f32.mrb[139].mxu0  ;;  %v3455_v53 = vpop.f32.mrb[139].mxu1 }
 0x1fd   :  { %v1622_v58 = vpop.f32.mrb[140].mxu1  ;;  %v1873_v55 = vpop.f32.mrb[140].mxu0 }
 0x1fe   :  { %v1706_v31 = vadd.f32 %v1622_v58, %v4816_v39  ;;  %v4970_v59 = vadd.f32 %v1873_v55, %v1704_v47  ;;  %v3458_v35 = vpop.f32.mrb[141].mxu1  ;;  %v3514_v5 = vpop.f32.mrb[141].mxu0 }
 0x1ff   :  { %v1625_v38 = vpop.f32.mrb[142].mxu1  ;;  %v1876_v30 = vpop.f32.mrb[142].mxu0 }
 0x200   :  { %v1707_v45 = vadd.f32 %v1625_v38, %v4823_v10  ;;  %v4973_v52 = vadd.f32 %v1876_v30, %v1705_v33  ;;  %v3515_v14 = vpop.f32.mrb[143].mxu0  ;;  %v3459_v13 = vpop.f32.mrb[143].mxu1 }
 0x205   :  { %v1630_v24 = vpop.f32.mrb[144].mxu1  ;;  %v1881_v46 = vpop.f32.mrb[144].mxu0 }
 0x206   :  { %v1708_v43 = vadd.f32 %v1630_v24, %v4833_v41  ;;  %v4976_v51 = vadd.f32 %v1881_v46, %v1706_v31  ;;  %v3462_v50 = vpop.f32.mrb[145].mxu1  ;;  %v3518_v39 = vpop.f32.mrb[145].mxu0 }
 0x207   :  { %v1633_v42 = vpop.f32.mrb[146].mxu1  ;;  %v1884_v54 = vpop.f32.mrb[146].mxu0 }
 0x208   :  { %v1709_v44 = vadd.f32 %v1633_v42, %v4840_v8  ;;  %v4979_v63 = vadd.f32 %v1884_v54, %v1707_v45  ;;  %v3519_v20 = vpop.f32.mrb[147].mxu0  ;;  %v3463_v10 = vpop.f32.mrb[147].mxu1 }
 0x20d   :  { %v1638_v4 = vpop.f32.mrb[148].mxu1  ;;  %v1889_v29 = vpop.f32.mrb[148].mxu0 }
 0x20e   :  { %v1710_v56 = vadd.f32 %v1638_v4, %v4850_v7  ;;  %v4982_v17 = vadd.f32 %v1889_v29, %v1708_v43  ;;  %v3466_v12 = vpop.f32.mrb[149].mxu1  ;;  %v3522_v41 = vpop.f32.mrb[149].mxu0 }
 0x20f   :  { %v1641_v22 = vpop.f32.mrb[150].mxu1  ;;  %v1892_v15 = vpop.f32.mrb[150].mxu0 }
 0x210   :  { %v1711_v19 = vadd.f32 %v1641_v22, %v4857_v3  ;;  %v4985_v0 = vadd.f32 %v1892_v15, %v1709_v44  ;;  %v3523_v48 = vpop.f32.mrb[151].mxu0  ;;  %v3467_v8 = vpop.f32.mrb[151].mxu1 }
 0x215   :  { %v1646_v40 = vpop.f32.mrb[152].mxu1  ;;  %v1897_v47 = vpop.f32.mrb[152].mxu0 }
 0x216   :  { %v1712_v34 = vadd.f32 %v1646_v40, %v4867_v27  ;;  %v4988_v62 = vadd.f32 %v1897_v47, %v1710_v56  ;;  %v3470_v18 = vpop.f32.mrb[153].mxu1  ;;  %v3526_v7 = vpop.f32.mrb[153].mxu0 }
 0x217   :  { %v1649_v32 = vpop.f32.mrb[154].mxu1  ;;  %v1900_v33 = vpop.f32.mrb[154].mxu0 }
 0x218   :  { %v1713_v61 = vadd.f32 %v1649_v32, %v4874_v26  ;;  %v4991_v53 = vadd.f32 %v1900_v33, %v1711_v19  ;;  %v3527_v58 = vpop.f32.mrb[155].mxu0  ;;  %v3471_v3 = vpop.f32.mrb[155].mxu1 }
 0x21d   :  { %v1654_v55 = vpop.f32.mrb[156].mxu1  ;;  %v1905_v31 = vpop.f32.mrb[156].mxu0 }
 0x21e   :  { %v1714_v35 = vadd.f32 %v1654_v55, %v4884_v49  ;;  %v4994_v5 = vadd.f32 %v1905_v31, %v1712_v34  ;;  %v3474_v38 = vpop.f32.mrb[157].mxu1  ;;  %v3530_v27 = vpop.f32.mrb[157].mxu0 }
 0x21f   :  { %v1657_v30 = vpop.f32.mrb[158].mxu1  ;;  %v1908_v45 = vpop.f32.mrb[158].mxu0 }
 0x220   :  { %v1715_v14 = vadd.f32 %v1657_v30, %v4891_v60  ;;  %v4997_v13 = vadd.f32 %v1908_v45, %v1713_v61  ;;  %v3531_v24 = vpop.f32.mrb[159].mxu0  ;;  %v3475_v26 = vpop.f32.mrb[159].mxu1 }
 0x225   :  { %v1662_v46 = vpop.f32.mrb[160].mxu1  ;;  %v1913_v43 = vpop.f32.mrb[160].mxu0 }
 0x226   :  { %v1716_v50 = vadd.f32 %v1662_v46, %v4901_v16  ;;  %v5000_v39 = vadd.f32 %v1913_v43, %v1714_v35  ;;  %v3478_v42 = vpop.f32.mrb[161].mxu1  ;;  %v3534_v49 = vpop.f32.mrb[161].mxu0 }
 0x227   :  { %v1665_v54 = vpop.f32.mrb[162].mxu1  ;;  %v1916_v44 = vpop.f32.mrb[162].mxu0 }
 0x228   :  { %v1717_v20 = vadd.f32 %v1665_v54, %v4910_v9  ;;  %v5003_v10 = vadd.f32 %v1916_v44, %v1715_v14  ;;  %v3535_v4 = vpop.f32.mrb[163].mxu0  ;;  %v3479_v60 = vpop.f32.mrb[163].mxu1 }
 0x22d   :  { %v1670_v29 = vpop.f32.mrb[164].mxu1  ;;  %v1921_v56 = vpop.f32.mrb[164].mxu0 }
 0x22e   :  { %v1718_v12 = vadd.f32 %v1670_v29, %v4920_v57  ;;  %v5006_v41 = vadd.f32 %v1921_v56, %v1716_v50  ;;  %v3482_v22 = vpop.f32.mrb[165].mxu1  ;;  %v3538_v16 = vpop.f32.mrb[165].mxu0 }
 0x22f   :  { %v1673_v15 = vpop.f32.mrb[166].mxu1  ;;  %v1924_v19 = vpop.f32.mrb[166].mxu0 }
 0x230   :  { %v1719_v48 = vadd.f32 %v1673_v15, %v4925_v37  ;;  %v5009_v8 = vadd.f32 %v1924_v19, %v1717_v20  ;;  %v3539_v40 = vpop.f32.mrb[167].mxu0  ;;  %v3483_v9 = vpop.f32.mrb[167].mxu1 }
 0x235   :  { %v1678_v47 = vpop.f32.mrb[168].mxu1  ;;  %v1929_v34 = vpop.f32.mrb[168].mxu0 }
 0x236   :  { %v1720_v18 = vadd.f32 %v1678_v47, %v4937_v1  ;;  %v5012_v7 = vadd.f32 %v1929_v34, %v1718_v12  ;;  %v3486_v32 = vpop.f32.mrb[169].mxu1  ;;  %v3542_v57 = vpop.f32.mrb[169].mxu0 }
 0x237   :  { %v1681_v33 = vpop.f32.mrb[170].mxu1  ;;  %v1932_v61 = vpop.f32.mrb[170].mxu0 }
 0x238   :  { %v1721_v58 = vadd.f32 %v1681_v33, %v4941_v28  ;;  %v5015_v3 = vadd.f32 %v1932_v61, %v1719_v48  ;;  %v3543_v55 = vpop.f32.mrb[171].mxu0  ;;  %v3487_v37 = vpop.f32.mrb[171].mxu1 }
 0x23d   :  { %v1686_v31 = vpop.f32.mrb[172].mxu1  ;;  %v1937_v35 = vpop.f32.mrb[172].mxu0 }
 0x23e   :  { %v1722_v38 = vadd.f32 %v1686_v31, %v4948_v6  ;;  %v5018_v27 = vadd.f32 %v1937_v35, %v1720_v18  ;;  %v3490_v30 = vpop.f32.mrb[173].mxu1  ;;  %v3546_v1 = vpop.f32.mrb[173].mxu0  ;;  %v5035_v18 = vld [vmem:[%s5188_s3] ss:$0 sm:$0xff] }
 0x23f   :  { %v1689_v45 = vpop.f32.mrb[174].mxu1  ;;  %v1940_v14 = vpop.f32.mrb[174].mxu0 }
 0x240   :  { %v1723_v24 = vadd.f32 %v1689_v45, %v4950_v23  ;;  %v5021_v26 = vadd.f32 %v1940_v14, %v1721_v58  ;;  %v3547_v46 = vpop.f32.mrb[175].mxu0  ;;  %v3491_v28 = vpop.f32.mrb[175].mxu1 }
 0x245   :  { %v1694_v43 = vpop.f32.mrb[176].mxu1  ;;  %v1945_v50 = vpop.f32.mrb[176].mxu0 }
 0x246   :  { %v1724_v42 = vadd.f32 %v1694_v43, %v4953_v11  ;;  %v5024_v49 = vadd.f32 %v1945_v50, %v1722_v38  ;;  %v3550_v54 = vpop.f32.mrb[177].mxu0  ;;  %v3494_v6 = vpop.f32.mrb[177].mxu1 }
 0x247   :  { %v1948_v44 = vpop.f32.mrb[178].mxu0  ;;  %v1697_v20 = vpop.f32.mrb[178].mxu1 }
 0x248   :  { %v5026_v4 = vadd.f32 %v1948_v44, %v1723_v24  ;;  %v3551_v60 = vpop.f32.mrb[179].mxu0  ;;  %v3495_v29 = vpop.f32.mrb[179].mxu1 }
 0x24d   :  { %v1953_v56 = vpop.f32.mrb[180].mxu0  ;;  %v2142_v23 = vpop.f32.mrb[180].mxu1 }
 0x24e   :  { %v5028_v12 = vadd.f32 %v1953_v56, %v1724_v42  ;;  %v2244_v22 = vadd.f32 %v2142_v23, %v4958_v21  ;;  %v3554_v16 = vpop.f32.mrb[181].mxu0  ;;  %v3566_v15 = vpop.f32.mrb[181].mxu1 }
 0x24f   :  { %v1956_v19 = vpop.f32.mrb[182].mxu0  ;;  %v2145_v11 = vpop.f32.mrb[182].mxu1 }
 0x250   :  { %v2245_v48 = vadd.f32 %v2145_v11, %v4961_v36  ;;  %v3555_v40 = vpop.f32.mrb[183].mxu0  ;;  %v3567_v9 = vpop.f32.mrb[183].mxu1 }
 0x255   :  { %v2150_v47 = vpop.f32.mrb[184].mxu1  ;;  %v2401_v34 = vpop.f32.mrb[184].mxu0 }
 0x256   :  { %v2246_v32 = vadd.f32 %v2150_v47, %v4964_v2  ;;  %v2503_v57 = vadd.f32 %v2401_v34, %v2244_v22  ;;  %v3570_v33 = vpop.f32.mrb[185].mxu1  ;;  %v3626_v21 = vpop.f32.mrb[185].mxu0 }
 0x257   :  { %v2153_v61 = vpop.f32.mrb[186].mxu1  ;;  %v2404_v58 = vpop.f32.mrb[186].mxu0 }
 0x258   :  { %v2535_v55 = vadd.f32 %v5035_v18, %v2503_v57  ;;  %v2247_v36 = vadd.f32 %v2153_v61, %v4967_v25  ;;  %v2504_v37 = vadd.f32 %v2404_v58, %v2245_v48  ;;  %v3627_v31 = vpop.f32.mrb[187].mxu0  ;;  %v3571_v35 = vpop.f32.mrb[187].mxu1 }
 0x25a   :  { %v2958_v38 = vpack.c.bf16 %v2535_v55, %v2535_v55  ;;  %v2536_v30 = vadd.f32 %v5035_v18, %v2504_v37 }
 0x25c   :  { %2662 = vst.msk [vmem:[%s5189_s4] sm:$0xf] %vm2661_vm11, %v2958_v38  ;;  %v2959_v2 = vpack.c.bf16 %v2536_v30, %v2536_v30 }
 0x25d   :  { %v2158_v1 = vpop.f32.mrb[188].mxu1  ;;  %v2409_v45 = vpop.f32.mrb[188].mxu0 }
 0x25e   :  { %2663 = vst.msk [vmem:[%s5189_s4 + $0x4] sm:$0xf] %vm2661_vm11, %v2959_v2  ;;  %v2248_v25 = vadd.f32 %v2158_v1, %v4970_v59  ;;  %v2505_v14 = vadd.f32 %v2409_v45, %v2246_v32  ;;  %v3574_v24 = vpop.f32.mrb[189].mxu1  ;;  %v3630_v46 = vpop.f32.mrb[189].mxu0 }
 0x25f   :  { %v2161_v28 = vpop.f32.mrb[190].mxu1  ;;  %v2412_v43 = vpop.f32.mrb[190].mxu0 }
 0x260   :  { %v2537_v50 = vadd.f32 %v5035_v18, %v2505_v14  ;;  %v2249_v42 = vadd.f32 %v2161_v28, %v4973_v52  ;;  %v2506_v54 = vadd.f32 %v2412_v43, %v2247_v36  ;;  %v3631_v6 = vpop.f32.mrb[191].mxu0  ;;  %v3575_v44 = vpop.f32.mrb[191].mxu1 }
 0x262   :  { %v2960_v20 = vpack.c.bf16 %v2537_v50, %v2537_v50  ;;  %v2538_v60 = vadd.f32 %v5035_v18, %v2506_v54 }
 0x264   :  { %2664 = vst.msk [vmem:[%s5189_s4 + $0x8] sm:$0xf] %vm2661_vm11, %v2960_v20  ;;  %v2961_v59 = vpack.c.bf16 %v2538_v60, %v2538_v60 }
 0x265   :  { %v2166_v29 = vpop.f32.mrb[192].mxu1  ;;  %v2417_v56 = vpop.f32.mrb[192].mxu0 }
 0x266   :  { %2665 = vst.msk [vmem:[%s5189_s4 + $0xc] sm:$0xf] %vm2661_vm11, %v2961_v59  ;;  %v2250_v52 = vadd.f32 %v2166_v29, %v4976_v51  ;;  %v2507_v23 = vadd.f32 %v2417_v56, %v2248_v25  ;;  %v3578_v22 = vpop.f32.mrb[193].mxu1  ;;  %v3634_v16 = vpop.f32.mrb[193].mxu0 }
 0x267   :  { %v2169_v15 = vpop.f32.mrb[194].mxu1  ;;  %v2420_v19 = vpop.f32.mrb[194].mxu0 }
 0x268   :  { %v2539_v11 = vadd.f32 %v5035_v18, %v2507_v23  ;;  %v2251_v48 = vadd.f32 %v2169_v15, %v4979_v63  ;;  %v2508_v40 = vadd.f32 %v2420_v19, %v2249_v42  ;;  %v3635_v9 = vpop.f32.mrb[195].mxu0  ;;  %v3579_v47 = vpop.f32.mrb[195].mxu1 }
 0x26a   :  { %v2962_v34 = vpack.c.bf16 %v2539_v11, %v2539_v11  ;;  %v2540_v32 = vadd.f32 %v5035_v18, %v2508_v40 }
 0x26c   :  { %2666 = vst.msk [vmem:[%s5189_s4 + $0x10] sm:$0xf] %vm2661_vm11, %v2962_v34  ;;  %v2963_v51 = vpack.c.bf16 %v2540_v32, %v2540_v32 }
 0x26d   :  { %v2174_v57 = vpop.f32.mrb[196].mxu1  ;;  %v2425_v33 = vpop.f32.mrb[196].mxu0 }
 0x26e   :  { %2667 = vst.msk [vmem:[%s5189_s4 + $0x14] sm:$0xf] %vm2661_vm11, %v2963_v51  ;;  %v2252_v63 = vadd.f32 %v2174_v57, %v4982_v17  ;;  %v2509_v21 = vadd.f32 %v2425_v33, %v2250_v52  ;;  %v3582_v61 = vpop.f32.mrb[197].mxu1  ;;  %v3638_v58 = vpop.f32.mrb[197].mxu0 }
 0x26f   :  { %v2177_v55 = vpop.f32.mrb[198].mxu1  ;;  %v2428_v36 = vpop.f32.mrb[198].mxu0 }
 0x270   :  { %v2541_v37 = vadd.f32 %v5035_v18, %v2509_v21  ;;  %v2253_v31 = vadd.f32 %v2177_v55, %v4985_v0  ;;  %v2510_v35 = vadd.f32 %v2428_v36, %v2251_v48  ;;  %v3639_v38 = vpop.f32.mrb[199].mxu0  ;;  %v3583_v30 = vpop.f32.mrb[199].mxu1 }
 0x272   :  { %v2964_v2 = vpack.c.bf16 %v2541_v37, %v2541_v37  ;;  %v2542_v1 = vadd.f32 %v5035_v18, %v2510_v35 }
 0x274   :  { %2668 = vst.msk [vmem:[%s5189_s4 + $0x18] sm:$0xf] %vm2661_vm11, %v2964_v2  ;;  %v2965_v17 = vpack.c.bf16 %v2542_v1, %v2542_v1 }
 0x275   :  { %v2182_v45 = vpop.f32.mrb[200].mxu1  ;;  %v2433_v25 = vpop.f32.mrb[200].mxu0 }
 0x276   :  { %2669 = vst.msk [vmem:[%s5189_s4 + $0x1c] sm:$0xf] %vm2661_vm11, %v2965_v17  ;;  %v2254_v0 = vadd.f32 %v2182_v45, %v4988_v62  ;;  %v2511_v14 = vadd.f32 %v2433_v25, %v2252_v63  ;;  %v3586_v24 = vpop.f32.mrb[201].mxu1  ;;  %v3642_v46 = vpop.f32.mrb[201].mxu0 }
 0x277   :  { %v2185_v28 = vpop.f32.mrb[202].mxu1  ;;  %v2436_v43 = vpop.f32.mrb[202].mxu0 }
 0x278   :  { %v2543_v50 = vadd.f32 %v5035_v18, %v2511_v14  ;;  %v2255_v42 = vadd.f32 %v2185_v28, %v4991_v53  ;;  %v2512_v54 = vadd.f32 %v2436_v43, %v2253_v31  ;;  %v3643_v6 = vpop.f32.mrb[203].mxu0  ;;  %v3587_v44 = vpop.f32.mrb[203].mxu1 }
 0x27a   :  { %v2966_v20 = vpack.c.bf16 %v2543_v50, %v2543_v50  ;;  %v2544_v60 = vadd.f32 %v5035_v18, %v2512_v54 }
 0x27c   :  { %2670 = vst.msk [vmem:[%s5189_s4 + $0x20] sm:$0xf] %vm2661_vm11, %v2966_v20  ;;  %v2967_v62 = vpack.c.bf16 %v2544_v60, %v2544_v60 }
 0x27d   :  { %v2190_v59 = vpop.f32.mrb[204].mxu1  ;;  %v2441_v29 = vpop.f32.mrb[204].mxu0 }
 0x27e   :  { %2671 = vst.msk [vmem:[%s5189_s4 + $0x24] sm:$0xf] %vm2661_vm11, %v2967_v62  ;;  %v2256_v53 = vadd.f32 %v2190_v59, %v4994_v5  ;;  %v2513_v56 = vadd.f32 %v2441_v29, %v2254_v0  ;;  %v3590_v52 = vpop.f32.mrb[205].mxu1  ;;  %v3646_v23 = vpop.f32.mrb[205].mxu0 }
 0x27f   :  { %v2193_v22 = vpop.f32.mrb[206].mxu1  ;;  %v2444_v16 = vpop.f32.mrb[206].mxu0 }
 0x280   :  { %v2545_v15 = vadd.f32 %v5035_v18, %v2513_v56  ;;  %v2257_v19 = vadd.f32 %v2193_v22, %v4997_v13  ;;  %v2514_v11 = vadd.f32 %v2444_v16, %v2255_v42  ;;  %v3647_v48 = vpop.f32.mrb[207].mxu0  ;;  %v3591_v40 = vpop.f32.mrb[207].mxu1 }
 0x282   :  { %v2968_v9 = vpack.c.bf16 %v2545_v15, %v2545_v15  ;;  %v2546_v47 = vadd.f32 %v5035_v18, %v2514_v11 }
 0x284   :  { %2672 = vst.msk [vmem:[%s5189_s4 + $0x28] sm:$0xf] %vm2661_vm11, %v2968_v9  ;;  %v2969_v5 = vpack.c.bf16 %v2546_v47, %v2546_v47 }
 0x285   :  { %v2198_v34 = vpop.f32.mrb[208].mxu1  ;;  %v2449_v32 = vpop.f32.mrb[208].mxu0 }
 0x286   :  { %2673 = vst.msk [vmem:[%s5189_s4 + $0x2c] sm:$0xf] %vm2661_vm11, %v2969_v5  ;;  %v2258_v13 = vadd.f32 %v2198_v34, %v5000_v39  ;;  %v2515_v51 = vadd.f32 %v2449_v32, %v2256_v53  ;;  %v3594_v57 = vpop.f32.mrb[209].mxu1  ;;  %v3650_v33 = vpop.f32.mrb[209].mxu0 }
 0x287   :  { %v2201_v63 = vpop.f32.mrb[210].mxu1  ;;  %v2452_v21 = vpop.f32.mrb[210].mxu0 }
 0x288   :  { %v2547_v61 = vadd.f32 %v5035_v18, %v2515_v51  ;;  %v2259_v58 = vadd.f32 %v2201_v63, %v5003_v10  ;;  %v2516_v55 = vadd.f32 %v2452_v21, %v2257_v19  ;;  %v3651_v36 = vpop.f32.mrb[211].mxu0  ;;  %v3595_v37 = vpop.f32.mrb[211].mxu1 }
 0x28a   :  { %v2970_v31 = vpack.c.bf16 %v2547_v61, %v2547_v61  ;;  %v2548_v35 = vadd.f32 %v5035_v18, %v2516_v55 }
 0x28c   :  { %2674 = vst.msk [vmem:[%s5189_s4 + $0x30] sm:$0xf] %vm2661_vm11, %v2970_v31  ;;  %v2971_v39 = vpack.c.bf16 %v2548_v35, %v2548_v35 }
 0x28d   :  { %v2206_v38 = vpop.f32.mrb[212].mxu1  ;;  %v2457_v30 = vpop.f32.mrb[212].mxu0 }
 0x28e   :  { %2675 = vst.msk [vmem:[%s5189_s4 + $0x34] sm:$0xf] %vm2661_vm11, %v2971_v39  ;;  %v2260_v10 = vadd.f32 %v2206_v38, %v5006_v41  ;;  %v2517_v2 = vadd.f32 %v2457_v30, %v2258_v13  ;;  %v3598_v1 = vpop.f32.mrb[213].mxu1  ;;  %v3654_v17 = vpop.f32.mrb[213].mxu0 }
 0x28f   :  { %v2209_v45 = vpop.f32.mrb[214].mxu1  ;;  %v2460_v25 = vpop.f32.mrb[214].mxu0 }
 0x290   :  { %v2549_v0 = vadd.f32 %v5035_v18, %v2517_v2  ;;  %v2261_v14 = vadd.f32 %v2209_v45, %v5009_v8  ;;  %v2518_v24 = vadd.f32 %v2460_v25, %v2259_v58  ;;  %v3655_v46 = vpop.f32.mrb[215].mxu0  ;;  %v3599_v28 = vpop.f32.mrb[215].mxu1 }
 0x292   :  { %v2972_v43 = vpack.c.bf16 %v2549_v0, %v2549_v0  ;;  %v2550_v50 = vadd.f32 %v5035_v18, %v2518_v24 }
 0x294   :  { %2676 = vst.msk [vmem:[%s5189_s4 + $0x38] sm:$0xf] %vm2661_vm11, %v2972_v43  ;;  %v2973_v41 = vpack.c.bf16 %v2550_v50, %v2550_v50 }
 0x295   :  { %v2214_v42 = vpop.f32.mrb[216].mxu1  ;;  %v2465_v54 = vpop.f32.mrb[216].mxu0 }
 0x296   :  { %2677 = vst.msk [vmem:[%s5189_s4 + $0x3c] sm:$0xf] %vm2661_vm11, %v2973_v41  ;;  %v2262_v8 = vadd.f32 %v2214_v42, %v5012_v7  ;;  %v2519_v6 = vadd.f32 %v2465_v54, %v2260_v10  ;;  %v3602_v44 = vpop.f32.mrb[217].mxu1  ;;  %v3658_v20 = vpop.f32.mrb[217].mxu0 }
 0x297   :  { %v2217_v60 = vpop.f32.mrb[218].mxu1  ;;  %v2468_v62 = vpop.f32.mrb[218].mxu0 }
 0x298   :  { %v2551_v59 = vadd.f32 %v5035_v18, %v2519_v6  ;;  %v2263_v29 = vadd.f32 %v2217_v60, %v5015_v3  ;;  %v2520_v53 = vadd.f32 %v2468_v62, %v2261_v14  ;;  %v3659_v56 = vpop.f32.mrb[219].mxu0  ;;  %v3603_v52 = vpop.f32.mrb[219].mxu1 }
 0x29a   :  { %v2974_v23 = vpack.c.bf16 %v2551_v59, %v2551_v59  ;;  %v2552_v22 = vadd.f32 %v5035_v18, %v2520_v53 }
 0x29c   :  { %2678 = vst.msk [vmem:[%s5189_s4 + $0x40] sm:$0xf] %vm2661_vm11, %v2974_v23  ;;  %v2975_v7 = vpack.c.bf16 %v2552_v22, %v2552_v22 }
 0x29d   :  { %v2222_v16 = vpop.f32.mrb[220].mxu1  ;;  %v2473_v15 = vpop.f32.mrb[220].mxu0 }
 0x29e   :  { %2679 = vst.msk [vmem:[%s5189_s4 + $0x44] sm:$0xf] %vm2661_vm11, %v2975_v7  ;;  %v2264_v3 = vadd.f32 %v2222_v16, %v5018_v27  ;;  %v2521_v19 = vadd.f32 %v2473_v15, %v2262_v8  ;;  %v3606_v11 = vpop.f32.mrb[221].mxu1  ;;  %v3662_v48 = vpop.f32.mrb[221].mxu0 }
 0x29f   :  { %v2225_v40 = vpop.f32.mrb[222].mxu1  ;;  %v2476_v9 = vpop.f32.mrb[222].mxu0 }
 0x2a0   :  { %v2553_v47 = vadd.f32 %v5035_v18, %v2521_v19  ;;  %v2265_v5 = vadd.f32 %v2225_v40, %v5021_v26  ;;  %v2522_v34 = vadd.f32 %v2476_v9, %v2263_v29  ;;  %v3663_v32 = vpop.f32.mrb[223].mxu0  ;;  %v3607_v13 = vpop.f32.mrb[223].mxu1 }
 0x2a2   :  { %v2976_v51 = vpack.c.bf16 %v2553_v47, %v2553_v47  ;;  %v2554_v57 = vadd.f32 %v5035_v18, %v2522_v34 }
 0x2a4   :  { %2680 = vst.msk [vmem:[%s5189_s4 + $0x48] sm:$0xf] %vm2661_vm11, %v2976_v51  ;;  %v2977_v27 = vpack.c.bf16 %v2554_v57, %v2554_v57 }
 0x2a5   :  { %v2230_v33 = vpop.f32.mrb[224].mxu1  ;;  %v2481_v63 = vpop.f32.mrb[224].mxu0 }
 0x2a6   :  { %2681 = vst.msk [vmem:[%s5189_s4 + $0x4c] sm:$0xf] %vm2661_vm11, %v2977_v27  ;;  %v2266_v26 = vadd.f32 %v2230_v33, %v5024_v49  ;;  %v2523_v21 = vadd.f32 %v2481_v63, %v2264_v3  ;;  %v3610_v61 = vpop.f32.mrb[225].mxu1  ;;  %v3666_v58 = vpop.f32.mrb[225].mxu0 }
 0x2a7   :  { %v2233_v55 = vpop.f32.mrb[226].mxu1  ;;  %v2484_v36 = vpop.f32.mrb[226].mxu0 }
 0x2a8   :  { %v2555_v37 = vadd.f32 %v5035_v18, %v2523_v21  ;;  %v2267_v31 = vadd.f32 %v2233_v55, %v5026_v4  ;;  %v2524_v35 = vadd.f32 %v2484_v36, %v2265_v5  ;;  %v3667_v39 = vpop.f32.mrb[227].mxu0  ;;  %v3611_v38 = vpop.f32.mrb[227].mxu1 }
 0x2aa   :  { %v2978_v30 = vpack.c.bf16 %v2555_v37, %v2555_v37  ;;  %v2556_v10 = vadd.f32 %v5035_v18, %v2524_v35 }
 0x2ac   :  { %2682 = vst.msk [vmem:[%s5189_s4 + $0x50] sm:$0xf] %vm2661_vm11, %v2978_v30  ;;  %v2979_v49 = vpack.c.bf16 %v2556_v10, %v2556_v10 }
 0x2ad   :  { %v2238_v2 = vpop.f32.mrb[228].mxu1  ;;  %v2489_v1 = vpop.f32.mrb[228].mxu0 }
 0x2ae   :  { %2683 = vst.msk [vmem:[%s5189_s4 + $0x54] sm:$0xf] %vm2661_vm11, %v2979_v49  ;;  %v2268_v4 = vadd.f32 %v2238_v2, %v5028_v12  ;;  %v2525_v17 = vadd.f32 %v2489_v1, %v2266_v26  ;;  %v3670_v45 = vpop.f32.mrb[229].mxu0  ;;  %v3614_v25 = vpop.f32.mrb[229].mxu1 }
 0x2af   :  { %v2492_v0 = vpop.f32.mrb[230].mxu0  ;;  %v2241_v14 = vpop.f32.mrb[230].mxu1 }
 0x2b0   :  { %v2557_v24 = vadd.f32 %v5035_v18, %v2525_v17  ;;  %v2526_v46 = vadd.f32 %v2492_v0, %v2267_v31  ;;  %v3671_v28 = vpop.f32.mrb[231].mxu0  ;;  %v3615_v43 = vpop.f32.mrb[231].mxu1 }
 0x2b2   :  { %v2980_v50 = vpack.c.bf16 %v2557_v24, %v2557_v24  ;;  %v2558_v41 = vadd.f32 %v5035_v18, %v2526_v46 }
 0x2b4   :  { %2684 = vst.msk [vmem:[%s5189_s4 + $0x58] sm:$0xf] %vm2661_vm11, %v2980_v50  ;;  %v2981_v42 = vpack.c.bf16 %v2558_v41, %v2558_v41 }
 0x2b5   :  { %v2497_v12 = vpop.f32.mrb[232].mxu0 }
 0x2b6   :  { %2685 = vst.msk [vmem:[%s5189_s4 + $0x5c] sm:$0xf] %vm2661_vm11, %v2981_v42  ;;  %v2527_v54 = vadd.f32 %v2497_v12, %v2268_v4  ;;  %v3674_v8 = vpop.f32.mrb[233].mxu0 }
 0x2b7   :  { %v2500_v6 = vpop.f32.mrb[234].mxu0 }
 0x2b8   :  { %v2559_v44 = vadd.f32 %v5035_v18, %v2527_v54  ;;  %v3675_v20 = vpop.f32.mrb[235].mxu0 }
 0x2ba   :  { %v2982_v60 = vpack.c.bf16 %v2559_v44, %v2559_v44 }
 0x2bc   :  { %2686 = vst.msk [vmem:[%s5189_s4 + $0x60] sm:$0xf] %vm2661_vm11, %v2982_v60 }

</bundles_post_ra>
